<compile_context>
chip_gen: v6e
topology: v6e:2x2x1
jax: 0.10.0
libtpu: 0.0.40
codegen_flags: <defaults>
</compile_context>

<pallas_src>
import functools

import jax
import jax.numpy as jnp
from jax.experimental import pallas as pl
from jax.experimental.pallas import tpu as pltpu

GN_EPS = 1e-5     # nn.GroupNorm default eps
WS_EPS = 1e-10    # StdConv2d weight-standardization eps
GROUPS = 32       # nn.GroupNorm(32, ...)


# ----------------------------------------------------------------------------
# helpers
# ----------------------------------------------------------------------------
def _pick_tile(dim, cap, mult):
    """Largest divisor of `dim` that is <= cap and a multiple of `mult`
    (falls back to the full dim, which always satisfies TPU block rules)."""
    if dim <= cap:
        return dim
    t = (cap // mult) * mult
    while t >= mult:
        if dim % t == 0:
            return t
        t -= mult
    return dim


def standardize_weight(w_oihw):
    """StdConv2d: standardize over (I, kh, kw), biased var, eps=1e-10 (f32)."""
    O = w_oihw.shape[0]
    wf = w_oihw.reshape(O, -1).astype(jnp.float32)
    m = jnp.mean(wf, axis=1, keepdims=True)
    v = jnp.mean((wf - m) ** 2, axis=1, keepdims=True)
    return ((wf - m) / jnp.sqrt(v + WS_EPS)).reshape(w_oihw.shape)


def std_w_1x1(w_oihw):
    """(O, I, 1, 1) -> (I, O) bf16 matmul weight."""
    return standardize_weight(w_oihw)[:, :, 0, 0].T.astype(jnp.bfloat16)


# ----------------------------------------------------------------------------
# Kernel 1: per-sample GroupNorm statistics -> per-channel scale/shift
# ----------------------------------------------------------------------------
def _gn_stats_kernel(x_ref, gamma_ref, beta_ref, proj_ref,
                     scale_ref, shift_ref, *, inv_cnt):
    x = x_ref[0].astype(jnp.float32)                       # (HW, C)
    proj = proj_ref[...]                                   # (C, C) group proj

    s1 = jnp.sum(x, axis=0, keepdims=True)                 # (1, C)
    mean_c = jnp.dot(s1, proj,
                     preferred_element_type=jnp.float32) * inv_cnt  # (1, C)

    d = x - mean_c                                         # two-pass variance
    s2 = jnp.sum(d * d, axis=0, keepdims=True)             # (1, C)
    var_c = jnp.dot(s2, proj,
                    preferred_element_type=jnp.float32) * inv_cnt   # (1, C)
    inv_c = jax.lax.rsqrt(var_c + GN_EPS)                  # (1, C)

    g = gamma_ref[...]
    scale_ref[0] = inv_c * g
    shift_ref[0] = beta_ref[...] - mean_c * inv_c * g


def gn_stats(x3, gamma, beta, groups=GROUPS):
    """x3: (N, HW, C) f32 -> per-(sample, channel) scale/shift (N, 1, C)."""
    N, HW, C = x3.shape
    cpg = C // groups
    gid = jnp.arange(C) // cpg
    proj = (gid[:, None] == gid[None, :]).astype(jnp.float32)   # (C, C)
    gamma2 = gamma.reshape(1, C).astype(jnp.float32)
    beta2 = beta.reshape(1, C).astype(jnp.float32)

    kern = functools.partial(_gn_stats_kernel, inv_cnt=1.0 / (HW * cpg))
    scale, shift = pl.pallas_call(
        kern,
        out_shape=(jax.ShapeDtypeStruct((N, 1, C), jnp.float32),
                   jax.ShapeDtypeStruct((N, 1, C), jnp.float32)),
        grid=(N,),
        in_specs=[
            pl.BlockSpec((1, HW, C), lambda n: (n, 0, 0)),
            pl.BlockSpec((1, C), lambda n: (0, 0)),
            pl.BlockSpec((1, C), lambda n: (0, 0)),
            pl.BlockSpec((C, C), lambda n: (0, 0)),
        ],
        out_specs=(pl.BlockSpec((1, 1, C), lambda n: (n, 0, 0)),
                   pl.BlockSpec((1, 1, C), lambda n: (n, 0, 0))),
        compiler_params=pltpu.CompilerParams(
            dimension_semantics=("parallel",)),
    )(x3, gamma2, beta2, proj)
    return scale, shift


# ----------------------------------------------------------------------------
# Kernels 2/3: tiled 1x1-conv matmul with fused GN-affine + ReLU
#              (optionally fused residual add)
# ----------------------------------------------------------------------------
def _mm1x1_kernel(scale_ref, shift_ref, a_ref, b_ref, o_ref, acc_ref):
    k = pl.program_id(2)

    @pl.when(k == 0)
    def _():
        acc_ref[...] = jnp.zeros_like(acc_ref)

    a = a_ref[0].astype(jnp.float32)                       # (tm, tk)
    a = jnp.maximum(a * scale_ref[0] + shift_ref[0], 0.0).astype(jnp.bfloat16)
    acc_ref[...] += jnp.dot(a, b_ref[...],
                            preferred_element_type=jnp.float32)

    @pl.when(k == pl.num_programs(2) - 1)
    def _():
        o_ref[0] = acc_ref[...]


def _mm1x1_add_kernel(scale_ref, shift_ref, a_ref, b_ref, r_ref, o_ref,
                      acc_ref):
    k = pl.program_id(2)

    @pl.when(k == 0)
    def _():
        acc_ref[...] = jnp.zeros_like(acc_ref)

    a = a_ref[0].astype(jnp.float32)
    a = jnp.maximum(a * scale_ref[0] + shift_ref[0], 0.0).astype(jnp.bfloat16)
    acc_ref[...] += jnp.dot(a, b_ref[...],
                            preferred_element_type=jnp.float32)

    @pl.when(k == pl.num_programs(2) - 1)
    def _():
        o_ref[0] = acc_ref[...] + r_ref[0]


def fused_conv1x1(x3, scale, shift, wmat_bf16, residual=None,
                  tm_cap=256, tk_cap=512):
    """out[n] = relu(x3[n]*scale[n]+shift[n]) @ W  (+ residual[n]).

    x3:       (N, M, K) f32
    scale/t:  (N, 1, K) f32  per-(sample, channel) GN scale/shift
    W:        (K, Cout) bf16
    residual: (N, M, Cout) f32 or None
    """
    N, M, K = x3.shape
    Cout = wmat_bf16.shape[1]
    tm = _pick_tile(M, tm_cap, 8)
    tk = _pick_tile(K, tk_cap, 128)
    grid = (N, M // tm, K // tk)

    in_specs = [
        pl.BlockSpec((1, 1, tk), lambda n, m, k: (n, 0, k)),
        pl.BlockSpec((1, 1, tk), lambda n, m, k: (n, 0, k)),
        pl.BlockSpec((1, tm, tk), lambda n, m, k: (n, m, k)),
        pl.BlockSpec((tk, Cout), lambda n, m, k: (k, 0)),
    ]
    args = [scale, shift, x3, wmat_bf16]
    if residual is not None:
        in_specs.append(pl.BlockSpec((1, tm, Cout), lambda n, m, k: (n, m, 0)))
        args.append(residual)
        kern = _mm1x1_add_kernel
    else:
        kern = _mm1x1_kernel

    return pl.pallas_call(
        kern,
        out_shape=jax.ShapeDtypeStruct((N, M, Cout), jnp.float32),
        grid=grid,
        in_specs=in_specs,
        out_specs=pl.BlockSpec((1, tm, Cout), lambda n, m, k: (n, m, 0)),
        scratch_shapes=[pltpu.VMEM((tm, Cout), jnp.float32)],
        compiler_params=pltpu.CompilerParams(
            dimension_semantics=("parallel", "parallel", "arbitrary")),
    )(*args)


# ----------------------------------------------------------------------------
# Kernel 4: direct 3x3 conv (stride 1) with fused GN-affine + ReLU + pad mask
# ----------------------------------------------------------------------------
def _conv3x3_s1_kernel(scale_ref, shift_ref, x_ref, w_ref, o_ref, xn_ref, *,
                       H, W, Wp, L):
    # x_ref: (1, Hp*Wp, C) zero-padded raw activation (flattened spatially)
    x = x_ref[0].astype(jnp.float32)                       # (Hp*Wp, C)
    xn = jnp.maximum(x * scale_ref[0] + shift_ref[0], 0.0)
    # zero out padding positions (they must contribute 0 to the conv)
    idx = jax.lax.broadcasted_iota(jnp.int32, (x.shape[0], 1), 0)
    hh = idx // Wp
    ww = idx - hh * Wp
    valid = (hh >= 1) & (hh <= H) & (ww >= 1) & (ww <= W)
    xn_ref[...] = jnp.where(valid, xn, 0.0)

    acc = None
    for tap in range(9):                                   # unrolled 9 taps
        dh, dw = tap // 3, tap % 3
        start = dh * Wp + dw                               # static offset
        patch = xn_ref[pl.ds(start, L), :].astype(jnp.bfloat16)   # (L, C)
        contrib = jnp.dot(patch, w_ref[tap],
                          preferred_element_type=jnp.float32)     # (L, O)
        acc = contrib if acc is None else acc + contrib
    o_ref[0] = acc


def conv3x3_direct_s1(x_nhwc, scale, shift, w_std):
    """3x3, stride 1, pad 1 conv of relu(affine(x)); returns (N, H*W, O)."""
    N, H, W, C = x_nhwc.shape
    O = w_std.shape[0]
    Wp = W + 2
    Hp = H + 3                         # 1 top, 2 bottom (extra row is masked)
    L = H * Wp

    xp = jnp.pad(x_nhwc, ((0, 0), (1, 2), (1, 1), (0, 0)))
    xflat = xp.reshape(N, Hp * Wp, C)
    wk = jnp.transpose(w_std, (2, 3, 1, 0)).reshape(9, C, O)
    wk = wk.astype(jnp.bfloat16)

    kern = functools.partial(_conv3x3_s1_kernel, H=H, W=W, Wp=Wp, L=L)
    out = pl.pallas_call(
        kern,
        out_shape=jax.ShapeDtypeStruct((N, L, O), jnp.float32),
        grid=(N,),
        in_specs=[
            pl.BlockSpec((1, 1, C), lambda n: (n, 0, 0)),
            pl.BlockSpec((1, 1, C), lambda n: (n, 0, 0)),
            pl.BlockSpec((1, Hp * Wp, C), lambda n: (n, 0, 0)),
            pl.BlockSpec((9, C, O), lambda n: (0, 0, 0)),
        ],
        out_specs=pl.BlockSpec((1, L, O), lambda n: (n, 0, 0)),
        scratch_shapes=[pltpu.VMEM((Hp * Wp, C), jnp.float32)],
        compiler_params=pltpu.CompilerParams(
            dimension_semantics=("parallel",)),
    )(scale, shift, xflat, wk)

    out = out.reshape(N, H, Wp, O)[:, :, :W, :]            # drop junk columns
    return out.reshape(N, H * W, O)


# ----------------------------------------------------------------------------
# Kernel 5: standalone affine+ReLU (used only for the stride>1 3x3 fallback)
# ----------------------------------------------------------------------------
def _affine_relu_kernel(scale_ref, shift_ref, x_ref, o_ref):
    x = x_ref[0].astype(jnp.float32)
    o_ref[0] = jnp.maximum(x * scale_ref[0] + shift_ref[0], 0.0)


def affine_relu(x3, scale, shift):
    N, M, C = x3.shape
    tm = _pick_tile(M, 1024, 8)
    return pl.pallas_call(
        _affine_relu_kernel,
        out_shape=jax.ShapeDtypeStruct((N, M, C), jnp.float32),
        grid=(N, M // tm),
        in_specs=[
            pl.BlockSpec((1, 1, C), lambda n, m: (n, 0, 0)),
            pl.BlockSpec((1, 1, C), lambda n, m: (n, 0, 0)),
            pl.BlockSpec((1, tm, C), lambda n, m: (n, m, 0)),
        ],
        out_specs=pl.BlockSpec((1, tm, C), lambda n, m: (n, m, 0)),
        compiler_params=pltpu.CompilerParams(
            dimension_semantics=("parallel", "parallel")),
    )(scale, shift, x3)


def conv3x3_im2col(x_nhwc, scale, shift, w_std, stride):
    """Strided 3x3 conv fallback: affine+relu kernel, then tiled im2col matmul."""
    N, H, W, C = x_nhwc.shape
    O = w_std.shape[0]
    xn = affine_relu(x_nhwc.reshape(N, H * W, C), scale, shift)
    xn = xn.reshape(N, H, W, C)
    xp = jnp.pad(xn, ((0, 0), (1, 1), (1, 1), (0, 0)))
    Ho = (H - 1) // stride + 1
    Wo = (W - 1) // stride + 1
    patches = []
    for dh in range(3):
        for dw in range(3):
            patches.append(
                xp[:, dh:dh + (Ho - 1) * stride + 1:stride,
                      dw:dw + (Wo - 1) * stride + 1:stride, :])
    pat = jnp.concatenate(patches, axis=-1).reshape(N, Ho * Wo, 9 * C)
    wmat = jnp.transpose(w_std, (2, 3, 1, 0)).reshape(9 * C, O)
    wmat = wmat.astype(jnp.bfloat16)
    ones = jnp.ones((N, 1, 9 * C), jnp.float32)    # already normalized/relu'd
    zeros = jnp.zeros((N, 1, 9 * C), jnp.float32)
    return fused_conv1x1(pat, ones, zeros, wmat)


# ----------------------------------------------------------------------------
# PreActBottleneck forward (Pallas version)
# ----------------------------------------------------------------------------
def preact_bottleneck_forward(x_nchw, params, stride):
    x = jnp.transpose(x_nchw, (0, 2, 3, 1)).astype(jnp.float32)  # NHWC
    N, H, W, Cin = x.shape
    x3 = x.reshape(N, H * W, Cin)

    # gn1 statistics (application fused into conv1 / downsample)
    s1, t1 = gn_stats(x3, params["gn1_w"], params["gn1_b"])

    # conv1 (1x1) fused with gn1+relu
    w1 = std_w_1x1(params["conv1_w"])                      # (Cin, Cmid) bf16
    out1 = fused_conv1x1(x3, s1, t1, w1)                   # (N, HW, Cmid)
    Cmid = out1.shape[-1]

    # residual branch
    if "downsample_w" in params:
        xd = x[:, ::stride, ::stride, :]                   # spatial subsample
        Hd, Wd = xd.shape[1], xd.shape[2]
        wd = std_w_1x1(params["downsample_w"])             # (Cin, Cout) bf16
        residual = fused_conv1x1(xd.reshape(N, Hd * Wd, Cin), s1, t1, wd)
        Cout = residual.shape[-1]
    else:
        residual = x3                                      # Cin == Cout, s == 1
        Cout = Cin

    # gn2 statistics + 3x3 conv (stride)
    s2, t2 = gn_stats(out1, params["gn2_w"], params["gn2_b"])
    w2 = standardize_weight(params["conv2_w"])             # (Cmid, Cmid, 3, 3)
    if stride == 1:
        out2 = conv3x3_direct_s1(out1.reshape(N, H, W, Cmid), s2, t2, w2)
    else:
        out2 = conv3x3_im2col(out1.reshape(N, H, W, Cmid), s2, t2, w2, stride)
    Ho = (H - 1) // stride + 1
    Wo = (W - 1) // stride + 1

    # gn3 statistics + conv3 (1x1) fused with gn3+relu and the residual add
    s3, t3 = gn_stats(out2, params["gn3_w"], params["gn3_b"])
    w3 = std_w_1x1(params["conv3_w"])                      # (Cmid, Cout) bf16
    y = fused_conv1x1(out2, s3, t3, w3, residual=residual)

    y = y.reshape(N, Ho, Wo, Cout)
    return jnp.transpose(y, (0, 3, 1, 2))                  # back to NCHW


# ----------------------------------------------------------------------------
# Pure-JAX reference (NCHW, lax.conv, f32 HIGHEST) for correctness check
# ----------------------------------------------------------------------------
def reference_forward(x_nchw, params, stride):
    def gn(x, g, b):
        N, C, H, W = x.shape
        xg = x.reshape(N, GROUPS, C // GROUPS, H, W)
        m = xg.mean(axis=(2, 3, 4), keepdims=True)
        v = ((xg - m) ** 2).mean(axis=(2, 3, 4), keepdims=True)
        xn = ((xg - m) / jnp.sqrt(v + GN_EPS)).reshape(N, C, H, W)
        return xn * g.reshape(1, C, 1, 1) + b.reshape(1, C, 1, 1)

    def conv(x, w, s, pad):
        w = standardize_weight(w)
        return jax.lax.conv_general_dilated(
            x, w, (s, s), [(pad, pad), (pad, pad)],
            dimension_numbers=("NCHW", "OIHW", "NCHW"),
            precision=jax.lax.Precision.HIGHEST)

    out = jax.nn.relu(gn(x_nchw, params["gn1_w"], params["gn1_b"]))
    residual = x_nchw
    if "downsample_w" in params:
        residual = conv(out, params["downsample_w"], stride, 0)
    out = conv(out, params["conv1_w"], 1, 0)
    out = conv(jax.nn.relu(gn(out, params["gn2_w"], params["gn2_b"])),
               params["conv2_w"], stride, 1)
    out = conv(jax.nn.relu(gn(out, params["gn3_w"], params["gn3_b"])),
               params["conv3_w"], 1, 0)
    return out + residual


# ----------------------------------------------------------------------------
if __name__ == "__main__":
    configs = [
        # stride-2 block with projection shortcut (im2col fallback path)
        dict(N=2, CIN=64, COUT=128, CMID=32, H=8, W=8, STRIDE=2, DOWN=True),
        # stride-1 identity block (direct 3x3 conv kernel path)
        dict(N=2, CIN=64, COUT=64, CMID=32, H=8, W=8, STRIDE=1, DOWN=False),
    ]

    key = jax.random.PRNGKey(0)
    for ci, cfg in enumerate(configs):
        N, CIN, COUT, CMID = cfg["N"], cfg["CIN"], cfg["COUT"], cfg["CMID"]
        H, W, STRIDE = cfg["H"], cfg["W"], cfg["STRIDE"]

        key, *ks = jax.random.split(key, 12)
        params = {
            "gn1_w": 1.0 + 0.1 * jax.random.normal(ks[0], (CIN,), jnp.float32),
            "gn1_b": 0.1 * jax.random.normal(ks[1], (CIN,), jnp.float32),
            "conv1_w": 0.1 * jax.random.normal(ks[2], (CMID, CIN, 1, 1),
                                               jnp.float32),
            "gn2_w": 1.0 + 0.1 * jax.random.normal(ks[3], (CMID,), jnp.float32),
            "gn2_b": 0.1 * jax.random.normal(ks[4], (CMID,), jnp.float32),
            "conv2_w": 0.1 * jax.random.normal(ks[5], (CMID, CMID, 3, 3),
                                               jnp.float32),
            "gn3_w": 1.0 + 0.1 * jax.random.normal(ks[6], (CMID,), jnp.float32),
            "gn3_b": 0.1 * jax.random.normal(ks[7], (CMID,), jnp.float32),
            "conv3_w": 0.1 * jax.random.normal(ks[8], (COUT, CMID, 1, 1),
                                               jnp.float32),
        }
        if cfg["DOWN"]:
            params["downsample_w"] = 0.1 * jax.random.normal(
                ks[9], (COUT, CIN, 1, 1), jnp.float32)
        x = jax.random.normal(ks[10], (N, CIN, H, W), jnp.float32)

        fwd = jax.jit(functools.partial(preact_bottleneck_forward,
                                        stride=STRIDE))
        out = jax.block_until_ready(fwd(x, params))
        ref = jax.block_until_ready(reference_forward(x, params, STRIDE))

        Ho = (H - 1) // STRIDE + 1
        Wo = (W - 1) // STRIDE + 1
        assert out.shape == ref.shape == (N, COUT, Ho, Wo), out.shape

        err = float(jnp.max(jnp.abs(out - ref)))
        scale = float(jnp.max(jnp.abs(ref)))
        # bf16 MXU operands with f32 accumulation -> normalized max-error check
        assert err <= 2e-2 * max(scale, 1.0), (
            f"config {ci}: max abs err {err} (ref scale {scale})")

    print("KERNEL_OK")
</pallas_src>

<mosaic_0001>
module attributes {stable_mosaic.version = 11 : i64} {
  func.func @_gn_stats_kernel(%arg0: i32, %arg1: memref<1x64x32xf32, #tpu.memory_space<vmem>>, %arg2: memref<1x32xf32, #tpu.memory_space<vmem>>, %arg3: memref<1x32xf32, #tpu.memory_space<vmem>>, %arg4: memref<32x32xf32, #tpu.memory_space<vmem>>, %arg5: memref<1x1x32xf32, #tpu.memory_space<vmem>>, %arg6: memref<1x1x32xf32, #tpu.memory_space<vmem>>) attributes {dimension_semantics = [#tpu.dimension_semantics<parallel>], iteration_bounds = array<i64: 2>, scalar_prefetch = 0 : i64, scratch_operands = 0 : i64, tpu.core_type = #tpu.core_type<tc>, window_params = [{transform_indices = @transform_0, window_bounds = array<i64: 1, 64, 32>}, {pipeline_mode = #tpu.pipeline_mode<synchronous>, transform_indices = @transform_1, window_bounds = array<i64: 1, 32>}, {pipeline_mode = #tpu.pipeline_mode<synchronous>, transform_indices = @transform_2, window_bounds = array<i64: 1, 32>}, {pipeline_mode = #tpu.pipeline_mode<synchronous>, transform_indices = @transform_3, window_bounds = array<i64: 32, 32>}, {transform_indices = @transform_4, window_bounds = array<i64: 1, 1, 32>}, {transform_indices = @transform_5, window_bounds = array<i64: 1, 1, 32>}]} {
    %c0 = arith.constant 0 : index
    %c0_0 = arith.constant 0 : index
    %c0_1 = arith.constant 0 : index
    %0 = vector.load %arg1[%c0, %c0_0, %c0_1] : memref<1x64x32xf32, #tpu.memory_space<vmem>>, vector<1x64x32xf32>
    %1 = vector.shape_cast %0 : vector<1x64x32xf32> to vector<64x32xf32>
    %c0_2 = arith.constant 0 : index
    %c0_3 = arith.constant 0 : index
    %2 = vector.load %arg4[%c0_2, %c0_3] : memref<32x32xf32, #tpu.memory_space<vmem>>, vector<32x32xf32>
    %cst = arith.constant dense<0.000000e+00> : vector<32xf32>
    %3 = vector.multi_reduction <add>, %1, %cst [0] : vector<64x32xf32> to vector<32xf32>
    %4 = vector.shape_cast %3 : vector<32xf32> to vector<1x32xf32>
    %cst_4 = arith.constant dense<0.000000e+00> : vector<1x32xf32>
    %5 = tpu.matmul %4, %2, %cst_4 {dimension_numbers = #tpu.dot_dimension_numbers<[1], [0], [0], [1], [0, 0, 1, 1], [], []>} : vector<1x32xf32>, vector<32x32xf32>, vector<1x32xf32> -> vector<1x32xf32>
    %cst_5 = arith.constant 1.562500e-02 : f32
    %6 = vector.broadcast %cst_5 : f32 to vector<1x32xf32>
    %7 = arith.mulf %5, %6 : vector<1x32xf32>
    %8 = vector.broadcast %7 : vector<1x32xf32> to vector<64x32xf32>
    %9 = arith.subf %1, %8 : vector<64x32xf32>
    %10 = arith.mulf %9, %9 : vector<64x32xf32>
    %cst_6 = arith.constant dense<0.000000e+00> : vector<32xf32>
    %11 = vector.multi_reduction <add>, %10, %cst_6 [0] : vector<64x32xf32> to vector<32xf32>
    %12 = vector.shape_cast %11 : vector<32xf32> to vector<1x32xf32>
    %cst_7 = arith.constant dense<0.000000e+00> : vector<1x32xf32>
    %13 = tpu.matmul %12, %2, %cst_7 {dimension_numbers = #tpu.dot_dimension_numbers<[1], [0], [0], [1], [0, 0, 1, 1], [], []>} : vector<1x32xf32>, vector<32x32xf32>, vector<1x32xf32> -> vector<1x32xf32>
    %cst_8 = arith.constant 1.562500e-02 : f32
    %14 = vector.broadcast %cst_8 : f32 to vector<1x32xf32>
    %15 = arith.mulf %13, %14 : vector<1x32xf32>
    %cst_9 = arith.constant 9.99999974E-6 : f32
    %16 = vector.broadcast %cst_9 : f32 to vector<1x32xf32>
    %17 = arith.addf %15, %16 : vector<1x32xf32>
    %18 = math.rsqrt %17 : vector<1x32xf32>
    %c0_10 = arith.constant 0 : index
    %c0_11 = arith.constant 0 : index
    %19 = vector.load %arg2[%c0_10, %c0_11] : memref<1x32xf32, #tpu.memory_space<vmem>>, vector<1x32xf32>
    %20 = arith.mulf %18, %19 : vector<1x32xf32>
    %c0_12 = arith.constant 0 : index
    %c0_13 = arith.constant 0 : index
    %c0_14 = arith.constant 0 : index
    %21 = vector.load %arg5[%c0_12, %c0_13, %c0_14] : memref<1x1x32xf32, #tpu.memory_space<vmem>>, vector<1x1x32xf32>
    %22 = vector.shape_cast %21 : vector<1x1x32xf32> to vector<1x32xf32>
    %23 = vector.shape_cast %20 : vector<1x32xf32> to vector<1x1x32xf32>
    tpu.vector_store %arg5[%c0_12, %c0_13, %c0_14], %23 {strides = array<i32>} : memref<1x1x32xf32, #tpu.memory_space<vmem>>, vector<1x1x32xf32>,
    %c0_15 = arith.constant 0 : index
    %c0_16 = arith.constant 0 : index
    %24 = vector.load %arg3[%c0_15, %c0_16] : memref<1x32xf32, #tpu.memory_space<vmem>>, vector<1x32xf32>
    %25 = arith.mulf %7, %18 : vector<1x32xf32>
    %26 = arith.mulf %25, %19 : vector<1x32xf32>
    %27 = arith.subf %24, %26 : vector<1x32xf32>
    %c0_17 = arith.constant 0 : index
    %c0_18 = arith.constant 0 : index
    %c0_19 = arith.constant 0 : index
    %28 = vector.load %arg6[%c0_17, %c0_18, %c0_19] : memref<1x1x32xf32, #tpu.memory_space<vmem>>, vector<1x1x32xf32>
    %29 = vector.shape_cast %28 : vector<1x1x32xf32> to vector<1x32xf32>
    %30 = vector.shape_cast %27 : vector<1x32xf32> to vector<1x1x32xf32>
    tpu.vector_store %arg6[%c0_17, %c0_18, %c0_19], %30 {strides = array<i32>} : memref<1x1x32xf32, #tpu.memory_space<vmem>>, vector<1x1x32xf32>,
    return
  }
  func.func @transform_0(%arg0: i32) -> (i32, i32, i32) {
    %c0_i32 = arith.constant 0 : i32
    %c0_i32_0 = arith.constant 0 : i32
    %c0_i32_1 = arith.constant 0 : i32
    return %arg0, %c0_i32, %c0_i32_0 : i32, i32, i32
  }
  func.func @transform_1(%arg0: i32) -> (i32, i32) {
    %c0_i32 = arith.constant 0 : i32
    %c0_i32_0 = arith.constant 0 : i32
    %c0_i32_1 = arith.constant 0 : i32
    return %c0_i32, %c0_i32_0 : i32, i32
  }
  func.func @transform_2(%arg0: i32) -> (i32, i32) {
    %c0_i32 = arith.constant 0 : i32
    %c0_i32_0 = arith.constant 0 : i32
    %c0_i32_1 = arith.constant 0 : i32
    return %c0_i32, %c0_i32_0 : i32, i32
  }
  func.func @transform_3(%arg0: i32) -> (i32, i32) {
    %c0_i32 = arith.constant 0 : i32
    %c0_i32_0 = arith.constant 0 : i32
    %c0_i32_1 = arith.constant 0 : i32
    return %c0_i32, %c0_i32_0 : i32, i32
  }
  func.func @transform_4(%arg0: i32) -> (i32, i32, i32) {
    %c0_i32 = arith.constant 0 : i32
    %c0_i32_0 = arith.constant 0 : i32
    %c0_i32_1 = arith.constant 0 : i32
    return %arg0, %c0_i32, %c0_i32_0 : i32, i32, i32
  }
  func.func @transform_5(%arg0: i32) -> (i32, i32, i32) {
    %c0_i32 = arith.constant 0 : i32
    %c0_i32_0 = arith.constant 0 : i32
    %c0_i32_1 = arith.constant 0 : i32
    return %arg0, %c0_i32, %c0_i32_0 : i32, i32, i32
  }
}

module attributes {stable_mosaic.version = 11 : i64} {
  func.func @_gn_stats_kernel(%arg0: i32, %arg1: memref<1x64x64xf32, #tpu.memory_space<vmem>>, %arg2: memref<1x64xf32, #tpu.memory_space<vmem>>, %arg3: memref<1x64xf32, #tpu.memory_space<vmem>>, %arg4: memref<64x64xf32, #tpu.memory_space<vmem>>, %arg5: memref<1x1x64xf32, #tpu.memory_space<vmem>>, %arg6: memref<1x1x64xf32, #tpu.memory_space<vmem>>) attributes {dimension_semantics = [#tpu.dimension_semantics<parallel>], iteration_bounds = array<i64: 2>, scalar_prefetch = 0 : i64, scratch_operands = 0 : i64, tpu.core_type = #tpu.core_type<tc>, window_params = [{transform_indices = @transform_0, window_bounds = array<i64: 1, 64, 64>}, {pipeline_mode = #tpu.pipeline_mode<synchronous>, transform_indices = @transform_1, window_bounds = array<i64: 1, 64>}, {pipeline_mode = #tpu.pipeline_mode<synchronous>, transform_indices = @transform_2, window_bounds = array<i64: 1, 64>}, {pipeline_mode = #tpu.pipeline_mode<synchronous>, transform_indices = @transform_3, window_bounds = array<i64: 64, 64>}, {transform_indices = @transform_4, window_bounds = array<i64: 1, 1, 64>}, {transform_indices = @transform_5, window_bounds = array<i64: 1, 1, 64>}]} {
    %c0 = arith.constant 0 : index
    %c0_0 = arith.constant 0 : index
    %c0_1 = arith.constant 0 : index
    %0 = vector.load %arg1[%c0, %c0_0, %c0_1] : memref<1x64x64xf32, #tpu.memory_space<vmem>>, vector<1x64x64xf32>
    %1 = vector.shape_cast %0 : vector<1x64x64xf32> to vector<64x64xf32>
    %c0_2 = arith.constant 0 : index
    %c0_3 = arith.constant 0 : index
    %2 = vector.load %arg4[%c0_2, %c0_3] : memref<64x64xf32, #tpu.memory_space<vmem>>, vector<64x64xf32>
    %cst = arith.constant dense<0.000000e+00> : vector<64xf32>
    %3 = vector.multi_reduction <add>, %1, %cst [0] : vector<64x64xf32> to vector<64xf32>
    %4 = vector.shape_cast %3 : vector<64xf32> to vector<1x64xf32>
    %cst_4 = arith.constant dense<0.000000e+00> : vector<1x64xf32>
    %5 = tpu.matmul %4, %2, %cst_4 {dimension_numbers = #tpu.dot_dimension_numbers<[1], [0], [0], [1], [0, 0, 1, 1], [], []>} : vector<1x64xf32>, vector<64x64xf32>, vector<1x64xf32> -> vector<1x64xf32>
    %cst_5 = arith.constant 7.812500e-03 : f32
    %6 = vector.broadcast %cst_5 : f32 to vector<1x64xf32>
    %7 = arith.mulf %5, %6 : vector<1x64xf32>
    %8 = vector.broadcast %7 : vector<1x64xf32> to vector<64x64xf32>
    %9 = arith.subf %1, %8 : vector<64x64xf32>
    %10 = arith.mulf %9, %9 : vector<64x64xf32>
    %cst_6 = arith.constant dense<0.000000e+00> : vector<64xf32>
    %11 = vector.multi_reduction <add>, %10, %cst_6 [0] : vector<64x64xf32> to vector<64xf32>
    %12 = vector.shape_cast %11 : vector<64xf32> to vector<1x64xf32>
    %cst_7 = arith.constant dense<0.000000e+00> : vector<1x64xf32>
    %13 = tpu.matmul %12, %2, %cst_7 {dimension_numbers = #tpu.dot_dimension_numbers<[1], [0], [0], [1], [0, 0, 1, 1], [], []>} : vector<1x64xf32>, vector<64x64xf32>, vector<1x64xf32> -> vector<1x64xf32>
    %cst_8 = arith.constant 7.812500e-03 : f32
    %14 = vector.broadcast %cst_8 : f32 to vector<1x64xf32>
    %15 = arith.mulf %13, %14 : vector<1x64xf32>
    %cst_9 = arith.constant 9.99999974E-6 : f32
    %16 = vector.broadcast %cst_9 : f32 to vector<1x64xf32>
    %17 = arith.addf %15, %16 : vector<1x64xf32>
    %18 = math.rsqrt %17 : vector<1x64xf32>
    %c0_10 = arith.constant 0 : index
    %c0_11 = arith.constant 0 : index
    %19 = vector.load %arg2[%c0_10, %c0_11] : memref<1x64xf32, #tpu.memory_space<vmem>>, vector<1x64xf32>
    %20 = arith.mulf %18, %19 : vector<1x64xf32>
    %c0_12 = arith.constant 0 : index
    %c0_13 = arith.constant 0 : index
    %c0_14 = arith.constant 0 : index
    %21 = vector.load %arg5[%c0_12, %c0_13, %c0_14] : memref<1x1x64xf32, #tpu.memory_space<vmem>>, vector<1x1x64xf32>
    %22 = vector.shape_cast %21 : vector<1x1x64xf32> to vector<1x64xf32>
    %23 = vector.shape_cast %20 : vector<1x64xf32> to vector<1x1x64xf32>
    tpu.vector_store %arg5[%c0_12, %c0_13, %c0_14], %23 {strides = array<i32>} : memref<1x1x64xf32, #tpu.memory_space<vmem>>, vector<1x1x64xf32>,
    %c0_15 = arith.constant 0 : index
    %c0_16 = arith.constant 0 : index
    %24 = vector.load %arg3[%c0_15, %c0_16] : memref<1x64xf32, #tpu.memory_space<vmem>>, vector<1x64xf32>
    %25 = arith.mulf %7, %18 : vector<1x64xf32>
    %26 = arith.mulf %25, %19 : vector<1x64xf32>
    %27 = arith.subf %24, %26 : vector<1x64xf32>
    %c0_17 = arith.constant 0 : index
    %c0_18 = arith.constant 0 : index
    %c0_19 = arith.constant 0 : index
    %28 = vector.load %arg6[%c0_17, %c0_18, %c0_19] : memref<1x1x64xf32, #tpu.memory_space<vmem>>, vector<1x1x64xf32>
    %29 = vector.shape_cast %28 : vector<1x1x64xf32> to vector<1x64xf32>
    %30 = vector.shape_cast %27 : vector<1x64xf32> to vector<1x1x64xf32>
    tpu.vector_store %arg6[%c0_17, %c0_18, %c0_19], %30 {strides = array<i32>} : memref<1x1x64xf32, #tpu.memory_space<vmem>>, vector<1x1x64xf32>,
    return
  }
  func.func @transform_0(%arg0: i32) -> (i32, i32, i32) {
    %c0_i32 = arith.constant 0 : i32
    %c0_i32_0 = arith.constant 0 : i32
    %c0_i32_1 = arith.constant 0 : i32
    return %arg0, %c0_i32, %c0_i32_0 : i32, i32, i32
  }
  func.func @transform_1(%arg0: i32) -> (i32, i32) {
    %c0_i32 = arith.constant 0 : i32
    %c0_i32_0 = arith.constant 0 : i32
    %c0_i32_1 = arith.constant 0 : i32
    return %c0_i32, %c0_i32_0 : i32, i32
  }
  func.func @transform_2(%arg0: i32) -> (i32, i32) {
    %c0_i32 = arith.constant 0 : i32
    %c0_i32_0 = arith.constant 0 : i32
    %c0_i32_1 = arith.constant 0 : i32
    return %c0_i32, %c0_i32_0 : i32, i32
  }
  func.func @transform_3(%arg0: i32) -> (i32, i32) {
    %c0_i32 = arith.constant 0 : i32
    %c0_i32_0 = arith.constant 0 : i32
    %c0_i32_1 = arith.constant 0 : i32
    return %c0_i32, %c0_i32_0 : i32, i32
  }
  func.func @transform_4(%arg0: i32) -> (i32, i32, i32) {
    %c0_i32 = arith.constant 0 : i32
    %c0_i32_0 = arith.constant 0 : i32
    %c0_i32_1 = arith.constant 0 : i32
    return %arg0, %c0_i32, %c0_i32_0 : i32, i32, i32
  }
  func.func @transform_5(%arg0: i32) -> (i32, i32, i32) {
    %c0_i32 = arith.constant 0 : i32
    %c0_i32_0 = arith.constant 0 : i32
    %c0_i32_1 = arith.constant 0 : i32
    return %arg0, %c0_i32, %c0_i32_0 : i32, i32, i32
  }
}

module attributes {stable_mosaic.version = 11 : i64} {
  func.func @_mm1x1_kernel(%arg0: i32, %arg1: i32, %arg2: i32, %arg3: memref<1x1x64xf32, #tpu.memory_space<vmem>>, %arg4: memref<1x1x64xf32, #tpu.memory_space<vmem>>, %arg5: memref<1x64x64xf32, #tpu.memory_space<vmem>>, %arg6: memref<64x32xbf16, #tpu.memory_space<vmem>>, %arg7: memref<1x64x32xf32, #tpu.memory_space<vmem>>, %arg8: memref<64x32xf32, #tpu.memory_space<vmem>>) attributes {dimension_semantics = [#tpu.dimension_semantics<parallel>, #tpu.dimension_semantics<parallel>, #tpu.dimension_semantics<arbitrary>], iteration_bounds = array<i64: 2, 1, 1>, scalar_prefetch = 0 : i64, scratch_operands = 1 : i64, tpu.core_type = #tpu.core_type<tc>, window_params = [{transform_indices = @transform_0, window_bounds = array<i64: 1, 1, 64>}, {transform_indices = @transform_1, window_bounds = array<i64: 1, 1, 64>}, {transform_indices = @transform_2, window_bounds = array<i64: 1, 64, 64>}, {transform_indices = @transform_3, window_bounds = array<i64: 64, 32>}, {transform_indices = @transform_4, window_bounds = array<i64: 1, 64, 32>}]} {
    %c0_i32 = arith.constant 0 : i32
    %0 = arith.cmpi eq, %arg2, %c0_i32 : i32
    %1 = arith.extui %0 : i1 to i32
    %c0_i32_0 = arith.constant 0 : i32
    %2 = arith.cmpi ne, %1, %c0_i32_0 : i32
    scf.if %2 {
      %cst_18 = arith.constant 0.000000e+00 : f32
      %24 = vector.broadcast %cst_18 : f32 to vector<64x32xf32>
      %c0_19 = arith.constant 0 : index
      %c0_20 = arith.constant 0 : index
      %25 = vector.load %arg8[%c0_19, %c0_20] : memref<64x32xf32, #tpu.memory_space<vmem>>, vector<64x32xf32>
      tpu.vector_store %arg8[%c0_19, %c0_20], %24 {strides = array<i32>} : memref<64x32xf32, #tpu.memory_space<vmem>>, vector<64x32xf32>,
    } else {
    }
    %c0 = arith.constant 0 : index
    %c0_1 = arith.constant 0 : index
    %c0_2 = arith.constant 0 : index
    %3 = vector.load %arg5[%c0, %c0_1, %c0_2] : memref<1x64x64xf32, #tpu.memory_space<vmem>>, vector<1x64x64xf32>
    %4 = vector.shape_cast %3 : vector<1x64x64xf32> to vector<64x64xf32>
    %c0_3 = arith.constant 0 : index
    %c0_4 = arith.constant 0 : index
    %c0_5 = arith.constant 0 : index
    %5 = vector.load %arg3[%c0_3, %c0_4, %c0_5] : memref<1x1x64xf32, #tpu.memory_space<vmem>>, vector<1x1x64xf32>
    %6 = vector.shape_cast %5 : vector<1x1x64xf32> to vector<1x64xf32>
    %7 = vector.broadcast %6 : vector<1x64xf32> to vector<64x64xf32>
    %8 = arith.mulf %4, %7 : vector<64x64xf32>
    %c0_6 = arith.constant 0 : index
    %c0_7 = arith.constant 0 : index
    %c0_8 = arith.constant 0 : index
    %9 = vector.load %arg4[%c0_6, %c0_7, %c0_8] : memref<1x1x64xf32, #tpu.memory_space<vmem>>, vector<1x1x64xf32>
    %10 = vector.shape_cast %9 : vector<1x1x64xf32> to vector<1x64xf32>
    %11 = vector.broadcast %10 : vector<1x64xf32> to vector<64x64xf32>
    %12 = arith.addf %8, %11 : vector<64x64xf32>
    %cst = arith.constant 0.000000e+00 : f32
    %13 = vector.broadcast %cst : f32 to vector<64x64xf32>
    %14 = arith.maximumf %12, %13 : vector<64x64xf32>
    %15 = arith.truncf %14 : vector<64x64xf32> to vector<64x64xbf16>
    %c0_9 = arith.constant 0 : index
    %c0_10 = arith.constant 0 : index
    %16 = vector.load %arg8[%c0_9, %c0_10] : memref<64x32xf32, #tpu.memory_space<vmem>>, vector<64x32xf32>
    %c0_11 = arith.constant 0 : index
    %c0_12 = arith.constant 0 : index
    %17 = vector.load %arg6[%c0_11, %c0_12] : memref<64x32xbf16, #tpu.memory_space<vmem>>, vector<64x32xbf16>
    %cst_13 = arith.constant dense<0.000000e+00> : vector<64x32xf32>
    %18 = tpu.matmul %15, %17, %cst_13 {dimension_numbers = #tpu.dot_dimension_numbers<[1], [0], [0], [1], [0, 0, 1, 1], [], []>} : vector<64x64xbf16>, vector<64x32xbf16>, vector<64x32xf32> -> vector<64x32xf32>
    %19 = arith.addf %16, %18 : vector<64x32xf32>
    %c0_14 = arith.constant 0 : index
    %c0_15 = arith.constant 0 : index
    %20 = vector.load %arg8[%c0_14, %c0_15] : memref<64x32xf32, #tpu.memory_space<vmem>>, vector<64x32xf32>
    tpu.vector_store %arg8[%c0_14, %c0_15], %19 {strides = array<i32>} : memref<64x32xf32, #tpu.memory_space<vmem>>, vector<64x32xf32>,
    %c0_i32_16 = arith.constant 0 : i32
    %21 = arith.cmpi eq, %arg2, %c0_i32_16 : i32
    %22 = arith.extui %21 : i1 to i32
    %c0_i32_17 = arith.constant 0 : i32
    %23 = arith.cmpi ne, %22, %c0_i32_17 : i32
    scf.if %23 {
      %c0_18 = arith.constant 0 : index
      %c0_19 = arith.constant 0 : index
      %24 = vector.load %arg8[%c0_18, %c0_19] : memref<64x32xf32, #tpu.memory_space<vmem>>, vector<64x32xf32>
      %c0_20 = arith.constant 0 : index
      %c0_21 = arith.constant 0 : index
      %c0_22 = arith.constant 0 : index
      %25 = vector.load %arg7[%c0_20, %c0_21, %c0_22] : memref<1x64x32xf32, #tpu.memory_space<vmem>>, vector<1x64x32xf32>
      %26 = vector.shape_cast %25 : vector<1x64x32xf32> to vector<64x32xf32>
      %27 = vector.shape_cast %24 : vector<64x32xf32> to vector<1x64x32xf32>
      tpu.vector_store %arg7[%c0_20, %c0_21, %c0_22], %27 {strides = array<i32>} : memref<1x64x32xf32, #tpu.memory_space<vmem>>, vector<1x64x32xf32>,
    } else {
    }
    return
  }
  func.func @transform_0(%arg0: i32, %arg1: i32, %arg2: i32) -> (i32, i32, i32) {
    %c0_i32 = arith.constant 0 : i32
    %c0_i32_0 = arith.constant 0 : i32
    return %arg0, %c0_i32, %arg2 : i32, i32, i32
  }
  func.func @transform_1(%arg0: i32, %arg1: i32, %arg2: i32) -> (i32, i32, i32) {
    %c0_i32 = arith.constant 0 : i32
    %c0_i32_0 = arith.constant 0 : i32
    return %arg0, %c0_i32, %arg2 : i32, i32, i32
  }
  func.func @transform_2(%arg0: i32, %arg1: i32, %arg2: i32) -> (i32, i32, i32) {
    %c0_i32 = arith.constant 0 : i32
    return %arg0, %arg1, %arg2 : i32, i32, i32
  }
  func.func @transform_3(%arg0: i32, %arg1: i32, %arg2: i32) -> (i32, i32) {
    %c0_i32 = arith.constant 0 : i32
    %c0_i32_0 = arith.constant 0 : i32
    return %arg2, %c0_i32 : i32, i32
  }
  func.func @transform_4(%arg0: i32, %arg1: i32, %arg2: i32) -> (i32, i32, i32) {
    %c0_i32 = arith.constant 0 : i32
    %c0_i32_0 = arith.constant 0 : i32
    return %arg0, %arg1, %c0_i32 : i32, i32, i32
  }
}

module attributes {stable_mosaic.version = 11 : i64} {
  func.func @_affine_relu_kernel(%arg0: i32, %arg1: i32, %arg2: memref<1x1x32xf32, #tpu.memory_space<vmem>>, %arg3: memref<1x1x32xf32, #tpu.memory_space<vmem>>, %arg4: memref<1x64x32xf32, #tpu.memory_space<vmem>>, %arg5: memref<1x64x32xf32, #tpu.memory_space<vmem>>) attributes {dimension_semantics = [#tpu.dimension_semantics<parallel>, #tpu.dimension_semantics<parallel>], iteration_bounds = array<i64: 2, 1>, scalar_prefetch = 0 : i64, scratch_operands = 0 : i64, tpu.core_type = #tpu.core_type<tc>, window_params = [{transform_indices = @transform_0, window_bounds = array<i64: 1, 1, 32>}, {transform_indices = @transform_1, window_bounds = array<i64: 1, 1, 32>}, {transform_indices = @transform_2, window_bounds = array<i64: 1, 64, 32>}, {transform_indices = @transform_3, window_bounds = array<i64: 1, 64, 32>}]} {
    %c0 = arith.constant 0 : index
    %c0_0 = arith.constant 0 : index
    %c0_1 = arith.constant 0 : index
    %0 = vector.load %arg4[%c0, %c0_0, %c0_1] : memref<1x64x32xf32, #tpu.memory_space<vmem>>, vector<1x64x32xf32>
    %1 = vector.shape_cast %0 : vector<1x64x32xf32> to vector<64x32xf32>
    %c0_2 = arith.constant 0 : index
    %c0_3 = arith.constant 0 : index
    %c0_4 = arith.constant 0 : index
    %2 = vector.load %arg2[%c0_2, %c0_3, %c0_4] : memref<1x1x32xf32, #tpu.memory_space<vmem>>, vector<1x1x32xf32>
    %3 = vector.shape_cast %2 : vector<1x1x32xf32> to vector<1x32xf32>
    %4 = vector.broadcast %3 : vector<1x32xf32> to vector<64x32xf32>
    %5 = arith.mulf %1, %4 : vector<64x32xf32>
    %c0_5 = arith.constant 0 : index
    %c0_6 = arith.constant 0 : index
    %c0_7 = arith.constant 0 : index
    %6 = vector.load %arg3[%c0_5, %c0_6, %c0_7] : memref<1x1x32xf32, #tpu.memory_space<vmem>>, vector<1x1x32xf32>
    %7 = vector.shape_cast %6 : vector<1x1x32xf32> to vector<1x32xf32>
    %8 = vector.broadcast %7 : vector<1x32xf32> to vector<64x32xf32>
    %9 = arith.addf %5, %8 : vector<64x32xf32>
    %cst = arith.constant 0.000000e+00 : f32
    %10 = vector.broadcast %cst : f32 to vector<64x32xf32>
    %11 = arith.maximumf %9, %10 : vector<64x32xf32>
    %c0_8 = arith.constant 0 : index
    %c0_9 = arith.constant 0 : index
    %c0_10 = arith.constant 0 : index
    %12 = vector.load %arg5[%c0_8, %c0_9, %c0_10] : memref<1x64x32xf32, #tpu.memory_space<vmem>>, vector<1x64x32xf32>
    %13 = vector.shape_cast %12 : vector<1x64x32xf32> to vector<64x32xf32>
    %14 = vector.shape_cast %11 : vector<64x32xf32> to vector<1x64x32xf32>
    tpu.vector_store %arg5[%c0_8, %c0_9, %c0_10], %14 {strides = array<i32>} : memref<1x64x32xf32, #tpu.memory_space<vmem>>, vector<1x64x32xf32>,
    return
  }
  func.func @transform_0(%arg0: i32, %arg1: i32) -> (i32, i32, i32) {
    %c0_i32 = arith.constant 0 : i32
    %c0_i32_0 = arith.constant 0 : i32
    %c0_i32_1 = arith.constant 0 : i32
    return %arg0, %c0_i32, %c0_i32_0 : i32, i32, i32
  }
  func.func @transform_1(%arg0: i32, %arg1: i32) -> (i32, i32, i32) {
    %c0_i32 = arith.constant 0 : i32
    %c0_i32_0 = arith.constant 0 : i32
    %c0_i32_1 = arith.constant 0 : i32
    return %arg0, %c0_i32, %c0_i32_0 : i32, i32, i32
  }
  func.func @transform_2(%arg0: i32, %arg1: i32) -> (i32, i32, i32) {
    %c0_i32 = arith.constant 0 : i32
    %c0_i32_0 = arith.constant 0 : i32
    return %arg0, %arg1, %c0_i32 : i32, i32, i32
  }
  func.func @transform_3(%arg0: i32, %arg1: i32) -> (i32, i32, i32) {
    %c0_i32 = arith.constant 0 : i32
    %c0_i32_0 = arith.constant 0 : i32
    return %arg0, %arg1, %c0_i32 : i32, i32, i32
  }
}

module attributes {stable_mosaic.version = 11 : i64} {
  func.func @_gn_stats_kernel(%arg0: i32, %arg1: memref<1x16x32xf32, #tpu.memory_space<vmem>>, %arg2: memref<1x32xf32, #tpu.memory_space<vmem>>, %arg3: memref<1x32xf32, #tpu.memory_space<vmem>>, %arg4: memref<32x32xf32, #tpu.memory_space<vmem>>, %arg5: memref<1x1x32xf32, #tpu.memory_space<vmem>>, %arg6: memref<1x1x32xf32, #tpu.memory_space<vmem>>) attributes {dimension_semantics = [#tpu.dimension_semantics<parallel>], iteration_bounds = array<i64: 2>, scalar_prefetch = 0 : i64, scratch_operands = 0 : i64, tpu.core_type = #tpu.core_type<tc>, window_params = [{transform_indices = @transform_0, window_bounds = array<i64: 1, 16, 32>}, {pipeline_mode = #tpu.pipeline_mode<synchronous>, transform_indices = @transform_1, window_bounds = array<i64: 1, 32>}, {pipeline_mode = #tpu.pipeline_mode<synchronous>, transform_indices = @transform_2, window_bounds = array<i64: 1, 32>}, {pipeline_mode = #tpu.pipeline_mode<synchronous>, transform_indices = @transform_3, window_bounds = array<i64: 32, 32>}, {transform_indices = @transform_4, window_bounds = array<i64: 1, 1, 32>}, {transform_indices = @transform_5, window_bounds = array<i64: 1, 1, 32>}]} {
    %c0 = arith.constant 0 : index
    %c0_0 = arith.constant 0 : index
    %c0_1 = arith.constant 0 : index
    %0 = vector.load %arg1[%c0, %c0_0, %c0_1] : memref<1x16x32xf32, #tpu.memory_space<vmem>>, vector<1x16x32xf32>
    %1 = vector.shape_cast %0 : vector<1x16x32xf32> to vector<16x32xf32>
    %c0_2 = arith.constant 0 : index
    %c0_3 = arith.constant 0 : index
    %2 = vector.load %arg4[%c0_2, %c0_3] : memref<32x32xf32, #tpu.memory_space<vmem>>, vector<32x32xf32>
    %cst = arith.constant dense<0.000000e+00> : vector<32xf32>
    %3 = vector.multi_reduction <add>, %1, %cst [0] : vector<16x32xf32> to vector<32xf32>
    %4 = vector.shape_cast %3 : vector<32xf32> to vector<1x32xf32>
    %cst_4 = arith.constant dense<0.000000e+00> : vector<1x32xf32>
    %5 = tpu.matmul %4, %2, %cst_4 {dimension_numbers = #tpu.dot_dimension_numbers<[1], [0], [0], [1], [0, 0, 1, 1], [], []>} : vector<1x32xf32>, vector<32x32xf32>, vector<1x32xf32> -> vector<1x32xf32>
    %cst_5 = arith.constant 6.250000e-02 : f32
    %6 = vector.broadcast %cst_5 : f32 to vector<1x32xf32>
    %7 = arith.mulf %5, %6 : vector<1x32xf32>
    %8 = vector.broadcast %7 : vector<1x32xf32> to vector<16x32xf32>
    %9 = arith.subf %1, %8 : vector<16x32xf32>
    %10 = arith.mulf %9, %9 : vector<16x32xf32>
    %cst_6 = arith.constant dense<0.000000e+00> : vector<32xf32>
    %11 = vector.multi_reduction <add>, %10, %cst_6 [0] : vector<16x32xf32> to vector<32xf32>
    %12 = vector.shape_cast %11 : vector<32xf32> to vector<1x32xf32>
    %cst_7 = arith.constant dense<0.000000e+00> : vector<1x32xf32>
    %13 = tpu.matmul %12, %2, %cst_7 {dimension_numbers = #tpu.dot_dimension_numbers<[1], [0], [0], [1], [0, 0, 1, 1], [], []>} : vector<1x32xf32>, vector<32x32xf32>, vector<1x32xf32> -> vector<1x32xf32>
    %cst_8 = arith.constant 6.250000e-02 : f32
    %14 = vector.broadcast %cst_8 : f32 to vector<1x32xf32>
    %15 = arith.mulf %13, %14 : vector<1x32xf32>
    %cst_9 = arith.constant 9.99999974E-6 : f32
    %16 = vector.broadcast %cst_9 : f32 to vector<1x32xf32>
    %17 = arith.addf %15, %16 : vector<1x32xf32>
    %18 = math.rsqrt %17 : vector<1x32xf32>
    %c0_10 = arith.constant 0 : index
    %c0_11 = arith.constant 0 : index
    %19 = vector.load %arg2[%c0_10, %c0_11] : memref<1x32xf32, #tpu.memory_space<vmem>>, vector<1x32xf32>
    %20 = arith.mulf %18, %19 : vector<1x32xf32>
    %c0_12 = arith.constant 0 : index
    %c0_13 = arith.constant 0 : index
    %c0_14 = arith.constant 0 : index
    %21 = vector.load %arg5[%c0_12, %c0_13, %c0_14] : memref<1x1x32xf32, #tpu.memory_space<vmem>>, vector<1x1x32xf32>
    %22 = vector.shape_cast %21 : vector<1x1x32xf32> to vector<1x32xf32>
    %23 = vector.shape_cast %20 : vector<1x32xf32> to vector<1x1x32xf32>
    tpu.vector_store %arg5[%c0_12, %c0_13, %c0_14], %23 {strides = array<i32>} : memref<1x1x32xf32, #tpu.memory_space<vmem>>, vector<1x1x32xf32>,
    %c0_15 = arith.constant 0 : index
    %c0_16 = arith.constant 0 : index
    %24 = vector.load %arg3[%c0_15, %c0_16] : memref<1x32xf32, #tpu.memory_space<vmem>>, vector<1x32xf32>
    %25 = arith.mulf %7, %18 : vector<1x32xf32>
    %26 = arith.mulf %25, %19 : vector<1x32xf32>
    %27 = arith.subf %24, %26 : vector<1x32xf32>
    %c0_17 = arith.constant 0 : index
    %c0_18 = arith.constant 0 : index
    %c0_19 = arith.constant 0 : index
    %28 = vector.load %arg6[%c0_17, %c0_18, %c0_19] : memref<1x1x32xf32, #tpu.memory_space<vmem>>, vector<1x1x32xf32>
    %29 = vector.shape_cast %28 : vector<1x1x32xf32> to vector<1x32xf32>
    %30 = vector.shape_cast %27 : vector<1x32xf32> to vector<1x1x32xf32>
    tpu.vector_store %arg6[%c0_17, %c0_18, %c0_19], %30 {strides = array<i32>} : memref<1x1x32xf32, #tpu.memory_space<vmem>>, vector<1x1x32xf32>,
    return
  }
  func.func @transform_0(%arg0: i32) -> (i32, i32, i32) {
    %c0_i32 = arith.constant 0 : i32
    %c0_i32_0 = arith.constant 0 : i32
    %c0_i32_1 = arith.constant 0 : i32
    return %arg0, %c0_i32, %c0_i32_0 : i32, i32, i32
  }
  func.func @transform_1(%arg0: i32) -> (i32, i32) {
    %c0_i32 = arith.constant 0 : i32
    %c0_i32_0 = arith.constant 0 : i32
    %c0_i32_1 = arith.constant 0 : i32
    return %c0_i32, %c0_i32_0 : i32, i32
  }
  func.func @transform_2(%arg0: i32) -> (i32, i32) {
    %c0_i32 = arith.constant 0 : i32
    %c0_i32_0 = arith.constant 0 : i32
    %c0_i32_1 = arith.constant 0 : i32
    return %c0_i32, %c0_i32_0 : i32, i32
  }
  func.func @transform_3(%arg0: i32) -> (i32, i32) {
    %c0_i32 = arith.constant 0 : i32
    %c0_i32_0 = arith.constant 0 : i32
    %c0_i32_1 = arith.constant 0 : i32
    return %c0_i32, %c0_i32_0 : i32, i32
  }
  func.func @transform_4(%arg0: i32) -> (i32, i32, i32) {
    %c0_i32 = arith.constant 0 : i32
    %c0_i32_0 = arith.constant 0 : i32
    %c0_i32_1 = arith.constant 0 : i32
    return %arg0, %c0_i32, %c0_i32_0 : i32, i32, i32
  }
  func.func @transform_5(%arg0: i32) -> (i32, i32, i32) {
    %c0_i32 = arith.constant 0 : i32
    %c0_i32_0 = arith.constant 0 : i32
    %c0_i32_1 = arith.constant 0 : i32
    return %arg0, %c0_i32, %c0_i32_0 : i32, i32, i32
  }
}

module attributes {stable_mosaic.version = 11 : i64} {
  func.func @_mm1x1_kernel(%arg0: i32, %arg1: i32, %arg2: i32, %arg3: memref<1x1x288xf32, #tpu.memory_space<vmem>>, %arg4: memref<1x1x288xf32, #tpu.memory_space<vmem>>, %arg5: memref<1x16x288xf32, #tpu.memory_space<vmem>>, %arg6: memref<288x32xbf16, #tpu.memory_space<vmem>>, %arg7: memref<1x16x32xf32, #tpu.memory_space<vmem>>, %arg8: memref<16x32xf32, #tpu.memory_space<vmem>>) attributes {dimension_semantics = [#tpu.dimension_semantics<parallel>, #tpu.dimension_semantics<parallel>, #tpu.dimension_semantics<arbitrary>], iteration_bounds = array<i64: 2, 1, 1>, scalar_prefetch = 0 : i64, scratch_operands = 1 : i64, tpu.core_type = #tpu.core_type<tc>, window_params = [{transform_indices = @transform_0, window_bounds = array<i64: 1, 1, 288>}, {transform_indices = @transform_1, window_bounds = array<i64: 1, 1, 288>}, {transform_indices = @transform_2, window_bounds = array<i64: 1, 16, 288>}, {transform_indices = @transform_3, window_bounds = array<i64: 288, 32>}, {transform_indices = @transform_4, window_bounds = array<i64: 1, 16, 32>}]} {
    %c0_i32 = arith.constant 0 : i32
    %0 = arith.cmpi eq, %arg2, %c0_i32 : i32
    %1 = arith.extui %0 : i1 to i32
    %c0_i32_0 = arith.constant 0 : i32
    %2 = arith.cmpi ne, %1, %c0_i32_0 : i32
    scf.if %2 {
      %cst_18 = arith.constant 0.000000e+00 : f32
      %24 = vector.broadcast %cst_18 : f32 to vector<16x32xf32>
      %c0_19 = arith.constant 0 : index
      %c0_20 = arith.constant 0 : index
      %25 = vector.load %arg8[%c0_19, %c0_20] : memref<16x32xf32, #tpu.memory_space<vmem>>, vector<16x32xf32>
      tpu.vector_store %arg8[%c0_19, %c0_20], %24 {strides = array<i32>} : memref<16x32xf32, #tpu.memory_space<vmem>>, vector<16x32xf32>,
    } else {
    }
    %c0 = arith.constant 0 : index
    %c0_1 = arith.constant 0 : index
    %c0_2 = arith.constant 0 : index
    %3 = vector.load %arg5[%c0, %c0_1, %c0_2] : memref<1x16x288xf32, #tpu.memory_space<vmem>>, vector<1x16x288xf32>
    %4 = vector.shape_cast %3 : vector<1x16x288xf32> to vector<16x288xf32>
    %c0_3 = arith.constant 0 : index
    %c0_4 = arith.constant 0 : index
    %c0_5 = arith.constant 0 : index
    %5 = vector.load %arg3[%c0_3, %c0_4, %c0_5] : memref<1x1x288xf32, #tpu.memory_space<vmem>>, vector<1x1x288xf32>
    %6 = vector.shape_cast %5 : vector<1x1x288xf32> to vector<1x288xf32>
    %7 = vector.broadcast %6 : vector<1x288xf32> to vector<16x288xf32>
    %8 = arith.mulf %4, %7 : vector<16x288xf32>
    %c0_6 = arith.constant 0 : index
    %c0_7 = arith.constant 0 : index
    %c0_8 = arith.constant 0 : index
    %9 = vector.load %arg4[%c0_6, %c0_7, %c0_8] : memref<1x1x288xf32, #tpu.memory_space<vmem>>, vector<1x1x288xf32>
    %10 = vector.shape_cast %9 : vector<1x1x288xf32> to vector<1x288xf32>
    %11 = vector.broadcast %10 : vector<1x288xf32> to vector<16x288xf32>
    %12 = arith.addf %8, %11 : vector<16x288xf32>
    %cst = arith.constant 0.000000e+00 : f32
    %13 = vector.broadcast %cst : f32 to vector<16x288xf32>
    %14 = arith.maximumf %12, %13 : vector<16x288xf32>
    %15 = arith.truncf %14 : vector<16x288xf32> to vector<16x288xbf16>
    %c0_9 = arith.constant 0 : index
    %c0_10 = arith.constant 0 : index
    %16 = vector.load %arg8[%c0_9, %c0_10] : memref<16x32xf32, #tpu.memory_space<vmem>>, vector<16x32xf32>
    %c0_11 = arith.constant 0 : index
    %c0_12 = arith.constant 0 : index
    %17 = vector.load %arg6[%c0_11, %c0_12] : memref<288x32xbf16, #tpu.memory_space<vmem>>, vector<288x32xbf16>
    %cst_13 = arith.constant dense<0.000000e+00> : vector<16x32xf32>
    %18 = tpu.matmul %15, %17, %cst_13 {dimension_numbers = #tpu.dot_dimension_numbers<[1], [0], [0], [1], [0, 0, 1, 1], [], []>} : vector<16x288xbf16>, vector<288x32xbf16>, vector<16x32xf32> -> vector<16x32xf32>
    %19 = arith.addf %16, %18 : vector<16x32xf32>
    %c0_14 = arith.constant 0 : index
    %c0_15 = arith.constant 0 : index
    %20 = vector.load %arg8[%c0_14, %c0_15] : memref<16x32xf32, #tpu.memory_space<vmem>>, vector<16x32xf32>
    tpu.vector_store %arg8[%c0_14, %c0_15], %19 {strides = array<i32>} : memref<16x32xf32, #tpu.memory_space<vmem>>, vector<16x32xf32>,
    %c0_i32_16 = arith.constant 0 : i32
    %21 = arith.cmpi eq, %arg2, %c0_i32_16 : i32
    %22 = arith.extui %21 : i1 to i32
    %c0_i32_17 = arith.constant 0 : i32
    %23 = arith.cmpi ne, %22, %c0_i32_17 : i32
    scf.if %23 {
      %c0_18 = arith.constant 0 : index
      %c0_19 = arith.constant 0 : index
      %24 = vector.load %arg8[%c0_18, %c0_19] : memref<16x32xf32, #tpu.memory_space<vmem>>, vector<16x32xf32>
      %c0_20 = arith.constant 0 : index
      %c0_21 = arith.constant 0 : index
      %c0_22 = arith.constant 0 : index
      %25 = vector.load %arg7[%c0_20, %c0_21, %c0_22] : memref<1x16x32xf32, #tpu.memory_space<vmem>>, vector<1x16x32xf32>
      %26 = vector.shape_cast %25 : vector<1x16x32xf32> to vector<16x32xf32>
      %27 = vector.shape_cast %24 : vector<16x32xf32> to vector<1x16x32xf32>
      tpu.vector_store %arg7[%c0_20, %c0_21, %c0_22], %27 {strides = array<i32>} : memref<1x16x32xf32, #tpu.memory_space<vmem>>, vector<1x16x32xf32>,
    } else {
    }
    return
  }
  func.func @transform_0(%arg0: i32, %arg1: i32, %arg2: i32) -> (i32, i32, i32) {
    %c0_i32 = arith.constant 0 : i32
    %c0_i32_0 = arith.constant 0 : i32
    return %arg0, %c0_i32, %arg2 : i32, i32, i32
  }
  func.func @transform_1(%arg0: i32, %arg1: i32, %arg2: i32) -> (i32, i32, i32) {
    %c0_i32 = arith.constant 0 : i32
    %c0_i32_0 = arith.constant 0 : i32
    return %arg0, %c0_i32, %arg2 : i32, i32, i32
  }
  func.func @transform_2(%arg0: i32, %arg1: i32, %arg2: i32) -> (i32, i32, i32) {
    %c0_i32 = arith.constant 0 : i32
    return %arg0, %arg1, %arg2 : i32, i32, i32
  }
  func.func @transform_3(%arg0: i32, %arg1: i32, %arg2: i32) -> (i32, i32) {
    %c0_i32 = arith.constant 0 : i32
    %c0_i32_0 = arith.constant 0 : i32
    return %arg2, %c0_i32 : i32, i32
  }
  func.func @transform_4(%arg0: i32, %arg1: i32, %arg2: i32) -> (i32, i32, i32) {
    %c0_i32 = arith.constant 0 : i32
    %c0_i32_0 = arith.constant 0 : i32
    return %arg0, %arg1, %c0_i32 : i32, i32, i32
  }
}

module attributes {stable_mosaic.version = 11 : i64} {
  func.func @_mm1x1_kernel(%arg0: i32, %arg1: i32, %arg2: i32, %arg3: memref<1x1x64xf32, #tpu.memory_space<vmem>>, %arg4: memref<1x1x64xf32, #tpu.memory_space<vmem>>, %arg5: memref<1x16x64xf32, #tpu.memory_space<vmem>>, %arg6: memref<64x128xbf16, #tpu.memory_space<vmem>>, %arg7: memref<1x16x128xf32, #tpu.memory_space<vmem>>, %arg8: memref<16x128xf32, #tpu.memory_space<vmem>>) attributes {dimension_semantics = [#tpu.dimension_semantics<parallel>, #tpu.dimension_semantics<parallel>, #tpu.dimension_semantics<arbitrary>], iteration_bounds = array<i64: 2, 1, 1>, scalar_prefetch = 0 : i64, scratch_operands = 1 : i64, tpu.core_type = #tpu.core_type<tc>, window_params = [{transform_indices = @transform_0, window_bounds = array<i64: 1, 1, 64>}, {transform_indices = @transform_1, window_bounds = array<i64: 1, 1, 64>}, {transform_indices = @transform_2, window_bounds = array<i64: 1, 16, 64>}, {transform_indices = @transform_3, window_bounds = array<i64: 64, 128>}, {transform_indices = @transform_4, window_bounds = array<i64: 1, 16, 128>}]} {
    %c0_i32 = arith.constant 0 : i32
    %0 = arith.cmpi eq, %arg2, %c0_i32 : i32
    %1 = arith.extui %0 : i1 to i32
    %c0_i32_0 = arith.constant 0 : i32
    %2 = arith.cmpi ne, %1, %c0_i32_0 : i32
    scf.if %2 {
      %cst_18 = arith.constant 0.000000e+00 : f32
      %24 = vector.broadcast %cst_18 : f32 to vector<16x128xf32>
      %c0_19 = arith.constant 0 : index
      %c0_20 = arith.constant 0 : index
      %25 = vector.load %arg8[%c0_19, %c0_20] : memref<16x128xf32, #tpu.memory_space<vmem>>, vector<16x128xf32>
      tpu.vector_store %arg8[%c0_19, %c0_20], %24 {strides = array<i32>} : memref<16x128xf32, #tpu.memory_space<vmem>>, vector<16x128xf32>,
    } else {
    }
    %c0 = arith.constant 0 : index
    %c0_1 = arith.constant 0 : index
    %c0_2 = arith.constant 0 : index
    %3 = vector.load %arg5[%c0, %c0_1, %c0_2] : memref<1x16x64xf32, #tpu.memory_space<vmem>>, vector<1x16x64xf32>
    %4 = vector.shape_cast %3 : vector<1x16x64xf32> to vector<16x64xf32>
    %c0_3 = arith.constant 0 : index
    %c0_4 = arith.constant 0 : index
    %c0_5 = arith.constant 0 : index
    %5 = vector.load %arg3[%c0_3, %c0_4, %c0_5] : memref<1x1x64xf32, #tpu.memory_space<vmem>>, vector<1x1x64xf32>
    %6 = vector.shape_cast %5 : vector<1x1x64xf32> to vector<1x64xf32>
    %7 = vector.broadcast %6 : vector<1x64xf32> to vector<16x64xf32>
    %8 = arith.mulf %4, %7 : vector<16x64xf32>
    %c0_6 = arith.constant 0 : index
    %c0_7 = arith.constant 0 : index
    %c0_8 = arith.constant 0 : index
    %9 = vector.load %arg4[%c0_6, %c0_7, %c0_8] : memref<1x1x64xf32, #tpu.memory_space<vmem>>, vector<1x1x64xf32>
    %10 = vector.shape_cast %9 : vector<1x1x64xf32> to vector<1x64xf32>
    %11 = vector.broadcast %10 : vector<1x64xf32> to vector<16x64xf32>
    %12 = arith.addf %8, %11 : vector<16x64xf32>
    %cst = arith.constant 0.000000e+00 : f32
    %13 = vector.broadcast %cst : f32 to vector<16x64xf32>
    %14 = arith.maximumf %12, %13 : vector<16x64xf32>
    %15 = arith.truncf %14 : vector<16x64xf32> to vector<16x64xbf16>
    %c0_9 = arith.constant 0 : index
    %c0_10 = arith.constant 0 : index
    %16 = vector.load %arg8[%c0_9, %c0_10] : memref<16x128xf32, #tpu.memory_space<vmem>>, vector<16x128xf32>
    %c0_11 = arith.constant 0 : index
    %c0_12 = arith.constant 0 : index
    %17 = vector.load %arg6[%c0_11, %c0_12] : memref<64x128xbf16, #tpu.memory_space<vmem>>, vector<64x128xbf16>
    %cst_13 = arith.constant dense<0.000000e+00> : vector<16x128xf32>
    %18 = tpu.matmul %15, %17, %cst_13 {dimension_numbers = #tpu.dot_dimension_numbers<[1], [0], [0], [1], [0, 0, 1, 1], [], []>} : vector<16x64xbf16>, vector<64x128xbf16>, vector<16x128xf32> -> vector<16x128xf32>
    %19 = arith.addf %16, %18 : vector<16x128xf32>
    %c0_14 = arith.constant 0 : index
    %c0_15 = arith.constant 0 : index
    %20 = vector.load %arg8[%c0_14, %c0_15] : memref<16x128xf32, #tpu.memory_space<vmem>>, vector<16x128xf32>
    tpu.vector_store %arg8[%c0_14, %c0_15], %19 {strides = array<i32>} : memref<16x128xf32, #tpu.memory_space<vmem>>, vector<16x128xf32>,
    %c0_i32_16 = arith.constant 0 : i32
    %21 = arith.cmpi eq, %arg2, %c0_i32_16 : i32
    %22 = arith.extui %21 : i1 to i32
    %c0_i32_17 = arith.constant 0 : i32
    %23 = arith.cmpi ne, %22, %c0_i32_17 : i32
    scf.if %23 {
      %c0_18 = arith.constant 0 : index
      %c0_19 = arith.constant 0 : index
      %24 = vector.load %arg8[%c0_18, %c0_19] : memref<16x128xf32, #tpu.memory_space<vmem>>, vector<16x128xf32>
      %c0_20 = arith.constant 0 : index
      %c0_21 = arith.constant 0 : index
      %c0_22 = arith.constant 0 : index
      %25 = vector.load %arg7[%c0_20, %c0_21, %c0_22] : memref<1x16x128xf32, #tpu.memory_space<vmem>>, vector<1x16x128xf32>
      %26 = vector.shape_cast %25 : vector<1x16x128xf32> to vector<16x128xf32>
      %27 = vector.shape_cast %24 : vector<16x128xf32> to vector<1x16x128xf32>
      tpu.vector_store %arg7[%c0_20, %c0_21, %c0_22], %27 {strides = array<i32>} : memref<1x16x128xf32, #tpu.memory_space<vmem>>, vector<1x16x128xf32>,
    } else {
    }
    return
  }
  func.func @transform_0(%arg0: i32, %arg1: i32, %arg2: i32) -> (i32, i32, i32) {
    %c0_i32 = arith.constant 0 : i32
    %c0_i32_0 = arith.constant 0 : i32
    return %arg0, %c0_i32, %arg2 : i32, i32, i32
  }
  func.func @transform_1(%arg0: i32, %arg1: i32, %arg2: i32) -> (i32, i32, i32) {
    %c0_i32 = arith.constant 0 : i32
    %c0_i32_0 = arith.constant 0 : i32
    return %arg0, %c0_i32, %arg2 : i32, i32, i32
  }
  func.func @transform_2(%arg0: i32, %arg1: i32, %arg2: i32) -> (i32, i32, i32) {
    %c0_i32 = arith.constant 0 : i32
    return %arg0, %arg1, %arg2 : i32, i32, i32
  }
  func.func @transform_3(%arg0: i32, %arg1: i32, %arg2: i32) -> (i32, i32) {
    %c0_i32 = arith.constant 0 : i32
    %c0_i32_0 = arith.constant 0 : i32
    return %arg2, %c0_i32 : i32, i32
  }
  func.func @transform_4(%arg0: i32, %arg1: i32, %arg2: i32) -> (i32, i32, i32) {
    %c0_i32 = arith.constant 0 : i32
    %c0_i32_0 = arith.constant 0 : i32
    return %arg0, %arg1, %c0_i32 : i32, i32, i32
  }
}

module attributes {stable_mosaic.version = 11 : i64} {
  func.func @_mm1x1_add_kernel(%arg0: i32, %arg1: i32, %arg2: i32, %arg3: memref<1x1x32xf32, #tpu.memory_space<vmem>>, %arg4: memref<1x1x32xf32, #tpu.memory_space<vmem>>, %arg5: memref<1x16x32xf32, #tpu.memory_space<vmem>>, %arg6: memref<32x128xbf16, #tpu.memory_space<vmem>>, %arg7: memref<1x16x128xf32, #tpu.memory_space<vmem>>, %arg8: memref<1x16x128xf32, #tpu.memory_space<vmem>>, %arg9: memref<16x128xf32, #tpu.memory_space<vmem>>) attributes {dimension_semantics = [#tpu.dimension_semantics<parallel>, #tpu.dimension_semantics<parallel>, #tpu.dimension_semantics<arbitrary>], iteration_bounds = array<i64: 2, 1, 1>, scalar_prefetch = 0 : i64, scratch_operands = 1 : i64, tpu.core_type = #tpu.core_type<tc>, window_params = [{transform_indices = @transform_0, window_bounds = array<i64: 1, 1, 32>}, {transform_indices = @transform_1, window_bounds = array<i64: 1, 1, 32>}, {transform_indices = @transform_2, window_bounds = array<i64: 1, 16, 32>}, {transform_indices = @transform_3, window_bounds = array<i64: 32, 128>}, {transform_indices = @transform_4, window_bounds = array<i64: 1, 16, 128>}, {transform_indices = @transform_5, window_bounds = array<i64: 1, 16, 128>}]} {
    %c0_i32 = arith.constant 0 : i32
    %0 = arith.cmpi eq, %arg2, %c0_i32 : i32
    %1 = arith.extui %0 : i1 to i32
    %c0_i32_0 = arith.constant 0 : i32
    %2 = arith.cmpi ne, %1, %c0_i32_0 : i32
    scf.if %2 {
      %cst_18 = arith.constant 0.000000e+00 : f32
      %24 = vector.broadcast %cst_18 : f32 to vector<16x128xf32>
      %c0_19 = arith.constant 0 : index
      %c0_20 = arith.constant 0 : index
      %25 = vector.load %arg9[%c0_19, %c0_20] : memref<16x128xf32, #tpu.memory_space<vmem>>, vector<16x128xf32>
      tpu.vector_store %arg9[%c0_19, %c0_20], %24 {strides = array<i32>} : memref<16x128xf32, #tpu.memory_space<vmem>>, vector<16x128xf32>,
    } else {
    }
    %c0 = arith.constant 0 : index
    %c0_1 = arith.constant 0 : index
    %c0_2 = arith.constant 0 : index
    %3 = vector.load %arg5[%c0, %c0_1, %c0_2] : memref<1x16x32xf32, #tpu.memory_space<vmem>>, vector<1x16x32xf32>
    %4 = vector.shape_cast %3 : vector<1x16x32xf32> to vector<16x32xf32>
    %c0_3 = arith.constant 0 : index
    %c0_4 = arith.constant 0 : index
    %c0_5 = arith.constant 0 : index
    %5 = vector.load %arg3[%c0_3, %c0_4, %c0_5] : memref<1x1x32xf32, #tpu.memory_space<vmem>>, vector<1x1x32xf32>
    %6 = vector.shape_cast %5 : vector<1x1x32xf32> to vector<1x32xf32>
    %7 = vector.broadcast %6 : vector<1x32xf32> to vector<16x32xf32>
    %8 = arith.mulf %4, %7 : vector<16x32xf32>
    %c0_6 = arith.constant 0 : index
    %c0_7 = arith.constant 0 : index
    %c0_8 = arith.constant 0 : index
    %9 = vector.load %arg4[%c0_6, %c0_7, %c0_8] : memref<1x1x32xf32, #tpu.memory_space<vmem>>, vector<1x1x32xf32>
    %10 = vector.shape_cast %9 : vector<1x1x32xf32> to vector<1x32xf32>
    %11 = vector.broadcast %10 : vector<1x32xf32> to vector<16x32xf32>
    %12 = arith.addf %8, %11 : vector<16x32xf32>
    %cst = arith.constant 0.000000e+00 : f32
    %13 = vector.broadcast %cst : f32 to vector<16x32xf32>
    %14 = arith.maximumf %12, %13 : vector<16x32xf32>
    %15 = arith.truncf %14 : vector<16x32xf32> to vector<16x32xbf16>
    %c0_9 = arith.constant 0 : index
    %c0_10 = arith.constant 0 : index
    %16 = vector.load %arg9[%c0_9, %c0_10] : memref<16x128xf32, #tpu.memory_space<vmem>>, vector<16x128xf32>
    %c0_11 = arith.constant 0 : index
    %c0_12 = arith.constant 0 : index
    %17 = vector.load %arg6[%c0_11, %c0_12] : memref<32x128xbf16, #tpu.memory_space<vmem>>, vector<32x128xbf16>
    %cst_13 = arith.constant dense<0.000000e+00> : vector<16x128xf32>
    %18 = tpu.matmul %15, %17, %cst_13 {dimension_numbers = #tpu.dot_dimension_numbers<[1], [0], [0], [1], [0, 0, 1, 1], [], []>} : vector<16x32xbf16>, vector<32x128xbf16>, vector<16x128xf32> -> vector<16x128xf32>
    %19 = arith.addf %16, %18 : vector<16x128xf32>
    %c0_14 = arith.constant 0 : index
    %c0_15 = arith.constant 0 : index
    %20 = vector.load %arg9[%c0_14, %c0_15] : memref<16x128xf32, #tpu.memory_space<vmem>>, vector<16x128xf32>
    tpu.vector_store %arg9[%c0_14, %c0_15], %19 {strides = array<i32>} : memref<16x128xf32, #tpu.memory_space<vmem>>, vector<16x128xf32>,
    %c0_i32_16 = arith.constant 0 : i32
    %21 = arith.cmpi eq, %arg2, %c0_i32_16 : i32
    %22 = arith.extui %21 : i1 to i32
    %c0_i32_17 = arith.constant 0 : i32
    %23 = arith.cmpi ne, %22, %c0_i32_17 : i32
    scf.if %23 {
      %c0_18 = arith.constant 0 : index
      %c0_19 = arith.constant 0 : index
      %24 = vector.load %arg9[%c0_18, %c0_19] : memref<16x128xf32, #tpu.memory_space<vmem>>, vector<16x128xf32>
      %c0_20 = arith.constant 0 : index
      %c0_21 = arith.constant 0 : index
      %c0_22 = arith.constant 0 : index
      %25 = vector.load %arg7[%c0_20, %c0_21, %c0_22] : memref<1x16x128xf32, #tpu.memory_space<vmem>>, vector<1x16x128xf32>
      %26 = vector.shape_cast %25 : vector<1x16x128xf32> to vector<16x128xf32>
      %27 = arith.addf %24, %26 : vector<16x128xf32>
      %c0_23 = arith.constant 0 : index
      %c0_24 = arith.constant 0 : index
      %c0_25 = arith.constant 0 : index
      %28 = vector.load %arg8[%c0_23, %c0_24, %c0_25] : memref<1x16x128xf32, #tpu.memory_space<vmem>>, vector<1x16x128xf32>
      %29 = vector.shape_cast %28 : vector<1x16x128xf32> to vector<16x128xf32>
      %30 = vector.shape_cast %27 : vector<16x128xf32> to vector<1x16x128xf32>
      tpu.vector_store %arg8[%c0_23, %c0_24, %c0_25], %30 {strides = array<i32>} : memref<1x16x128xf32, #tpu.memory_space<vmem>>, vector<1x16x128xf32>,
    } else {
    }
    return
  }
  func.func @transform_0(%arg0: i32, %arg1: i32, %arg2: i32) -> (i32, i32, i32) {
    %c0_i32 = arith.constant 0 : i32
    %c0_i32_0 = arith.constant 0 : i32
    return %arg0, %c0_i32, %arg2 : i32, i32, i32
  }
  func.func @transform_1(%arg0: i32, %arg1: i32, %arg2: i32) -> (i32, i32, i32) {
    %c0_i32 = arith.constant 0 : i32
    %c0_i32_0 = arith.constant 0 : i32
    return %arg0, %c0_i32, %arg2 : i32, i32, i32
  }
  func.func @transform_2(%arg0: i32, %arg1: i32, %arg2: i32) -> (i32, i32, i32) {
    %c0_i32 = arith.constant 0 : i32
    return %arg0, %arg1, %arg2 : i32, i32, i32
  }
  func.func @transform_3(%arg0: i32, %arg1: i32, %arg2: i32) -> (i32, i32) {
    %c0_i32 = arith.constant 0 : i32
    %c0_i32_0 = arith.constant 0 : i32
    return %arg2, %c0_i32 : i32, i32
  }
  func.func @transform_4(%arg0: i32, %arg1: i32, %arg2: i32) -> (i32, i32, i32) {
    %c0_i32 = arith.constant 0 : i32
    %c0_i32_0 = arith.constant 0 : i32
    return %arg0, %arg1, %c0_i32 : i32, i32, i32
  }
  func.func @transform_5(%arg0: i32, %arg1: i32, %arg2: i32) -> (i32, i32, i32) {
    %c0_i32 = arith.constant 0 : i32
    %c0_i32_0 = arith.constant 0 : i32
    return %arg0, %arg1, %c0_i32 : i32, i32, i32
  }
}

</mosaic_0001>

<bundles_post_ra>
// kernel: preact_bottleneck_forward.11
= control target key start
LH: loop header
LB: loop body
LE: loop exit
PB: predicated region body
PF: predicated region fallthrough
CT: control target
= control target key end

     0   :  { %s632_s18 = smov 0   ;;  %s695_s0 = inlined_call_operand.vmem [shape: f32[2,64,32], index: 0, kind: input, shape index: {}]   ;;  %s696_s1 = inlined_call_operand.vmem [shape: f32[1,32], index: 1, kind: input, shape index: {}]   ;;  %s697_s2 = inlined_call_operand.vmem [shape: f32[1,32], index: 2, kind: input, shape index: {}]   ;;  %s698_s3 = inlined_call_operand.vmem [shape: f32[32,32], index: 3, kind: input, shape index: {}]   ;;  %s699_s4 = inlined_call_operand.vmem [shape: f32[2,1,32], index: 4, kind: output, shape index: {0}]   ;;  %s700_s5 = inlined_call_operand.vmem [shape: f32[2,1,32], index: 5, kind: output, shape index: {1}]  }
   0x1 LB: > { %s536_s19 = sadd.s32 4294967295, %s598_s18   ;;  %p540_p0 = scmp.ge.s32.totalorder %s598_s18, 1  ;;  %s598_s18 = sphi %s632_s18, %s16_s18  }
   0x2   : > { %p190_p1 = scmp.lt.s32.totalorder %s598_s18, 3 }
   0x4   : > { %p191_p2 = pnand %p540_p0, %p190_p1 }
   0x5   : > { %p219_p3 = scmp.lt.s32.totalorder (!%p191_p2), %s536_s19, 1 }
   0x6   : > { %194 = sbr.rel (%p191_p2) target bundleno = 488 (0x1e8), region = 36 }
   0xb   : > { %v241_v0 = vld [vmem:[%s698_s3 + $0x18] sm:$0xff]  ;;  %v600_v1 = vmov 0.0   ;;  %v240_v2 = vld [vmem:[%s698_s3 + $0x10] sm:$0xff]  ;;  %vm601_vm0 = vmmov 0   ;;  %s702_s19 = smov (!%p219_p3, %s536_s19), 1  ;;  %v239_v3 = vld [vmem:[%s698_s3 + $0x8] sm:$0xff]  ;;  %v338_v34 = vlaneseq }
   0xc   : > { %558 = vmatprep.subr.mxu0 %v600_v1  ;;  %566 = vmatprep.mubr.msk.f32.mxu0 %vm601_vm0, %v600_v1  ;;  %s547_s26 = sshll.u32 %s702_s19, 6  ;;  %vm242_vm1 = vcmask 261120   ;;  %v238_v4 = vld [vmem:[%s698_s3] sm:$0xff]  ;;  %s226_s11 = scalar_lea.vmem %s699_s4, %s702_s19  ;;  %vm457_vm2 = vcmask 253952  }
   0xd   : > { %559 = vmatpush3.msra.mxu0 %v241_v0  ;;  %569 = vmatprep.subr.mxu1 %v600_v1  ;;  %s223_s6 = scalar_lea.vmem %s695_s0, %s547_s26  ;;  %v339_v35 = vshrl.u32 %v338_v34, 7  ;;  %s229_s16 = scalar_lea.vmem %s700_s5, %s702_s19 }
   0xe   : > { %560 = vmatprep.subr.mxu0 %v600_v1  ;;  %570 = vmatpush3.msra.mxu1 %v241_v0  ;;  %v230_v5 = vld [vmem:[%s223_s6] sm:$0xff]  ;;  %v231_v6 = vld [vmem:[%s223_s6 + $0x8] sm:$0xff]  ;;  %v232_v7 = vld [vmem:[%s223_s6 + $0x10] sm:$0xff] }
   0xf   : > { %561 = vmatpush3.msra.mxu0 %v240_v2  ;;  %571 = vmatprep.subr.mxu1 %v600_v1  ;;  %v233_v8 = vld [vmem:[%s223_s6 + $0x18] sm:$0xff]  ;;  %v243_v9 = vsel %vm242_vm1, %v230_v5, 0.0  ;;  %v244_v10 = vsel %vm242_vm1, %v231_v6, 0.0  ;;  %v246_v11 = vsel %vm242_vm1, %v232_v7, 0.0  ;;  %v234_v12 = vld [vmem:[%s223_s6 + $0x20] sm:$0xff]  ;;  %v235_v15 = vld [vmem:[%s223_s6 + $0x28] sm:$0xff] }
  0x10   : > { %562 = vmatprep.subr.mxu0 %v600_v1  ;;  %572 = vmatpush3.msra.mxu1 %v240_v2  ;;  %v245_v13 = vadd.f32 %v244_v10, %v243_v9  ;;  %v248_v14 = vsel %vm242_vm1, %v233_v8, 0.0  ;;  %v250_v17 = vsel %vm242_vm1, %v234_v12, 0.0  ;;  %v236_v18 = vld [vmem:[%s223_s6 + $0x30] sm:$0xff]  ;;  %v252_v20 = vsel %vm242_vm1, %v235_v15, 0.0  ;;  %v237_v21 = vld [vmem:[%s223_s6 + $0x38] sm:$0xff] }
  0x11   : > { %563 = vmatpush3.msra.mxu0 %v239_v3  ;;  %573 = vmatprep.subr.mxu1 %v600_v1  ;;  %v254_v23 = vsel %vm242_vm1, %v236_v18, 0.0  ;;  %v256_v25 = vsel %vm242_vm1, %v237_v21, 0.0  ;;  %v340_v36 = vsub.s32 0, %v339_v35 }
  0x12   : > { %564 = vmatprep.subr.mxu0 %v600_v1  ;;  %574 = vmatpush3.msra.mxu1 %v239_v3  ;;  %v247_v16 = vadd.f32 %v246_v11, %v245_v13 }
  0x13   : > { %565 = vmatpush3.msra.mxu0 %v238_v4  ;;  %575 = vmatprep.subr.mxu1 %v600_v1 }
  0x14   : > { %576 = vmatpush3.msra.mxu1 %v238_v4  ;;  %577 = vmatprep.mubr.msk.f32.mxu1 %vm601_vm0, %v600_v1  ;;  %v249_v19 = vadd.f32 %v248_v14, %v247_v16 }
  0x16   : > { %v251_v22 = vadd.f32 %v250_v17, %v249_v19 }
  0x18   : > { %v253_v24 = vadd.f32 %v252_v20, %v251_v22  ;;  %v459_v22 = vld [vmem:[%s697_s2] sm:$0x1] }
  0x1a   : > { %v255_v26 = vadd.f32 %v254_v23, %v253_v24 }
  0x1c   : > { %v257_v27 = vadd.f32 %v256_v25, %v255_v26 }
  0x1e   : > { %v258_v28 = vrot.slane %v257_v27, 4 }
  0x20   : > { %v259_v29 = vadd.f32 %v258_v28, %v257_v27 }
  0x22   : > { %v260_v30 = vrot.slane %v259_v29, 2 }
  0x24   : > { %v261_v31 = vadd.f32 %v260_v30, %v259_v29 }
  0x26   : > { %v262_v32 = vrot.slane %v261_v31, 1 }
  0x28   : > { %v263_v33 = vadd.f32 %v262_v32, %v261_v31 }
  0x2a   : > { %567 = vmatmul.mubr.msk.f32.vlgmr.msra.gmra.mxu0 %vm242_vm1, %v263_v33 }
  0xea   : > { %v333_v37 = vpop.f32.mrf.mxu0 }
  0xeb   : > { %v337_v38 = vmul.f32 0.015625, %v333_v37 }
  0xec   : > { %v568_v39 = vpop.f32.mrf.mxu0 }
  0xed   : > { %v341_v40 = vrot.slane %v337_v38, %v340_v36 }
  0xef   : > { %v342_v41 = vsub.f32 %v230_v5, %v341_v40  ;;  %v343_v42 = vsub.f32 %v231_v6, %v341_v40  ;;  %v344_v43 = vsub.f32 %v232_v7, %v341_v40  ;;  %v345_v44 = vsub.f32 %v233_v8, %v341_v40 }
  0xf0   : > { %v346_v45 = vsub.f32 %v234_v12, %v341_v40  ;;  %v347_v49 = vsub.f32 %v235_v15, %v341_v40  ;;  %v348_v54 = vsub.f32 %v236_v18, %v341_v40  ;;  %v349_v58 = vsub.f32 %v237_v21, %v341_v40  ;;  %v455_v18 = vld [vmem:[%s696_s1] sm:$0x1] }
  0xf1   : > { %v350_v46 = vmul.f32 %v342_v41, %v342_v41  ;;  %v351_v47 = vmul.f32 %v343_v42, %v343_v42  ;;  %v352_v48 = vmul.f32 %v344_v43, %v344_v43  ;;  %v353_v50 = vmul.f32 %v345_v44, %v345_v44 }
  0xf2   : > { %v354_v55 = vmul.f32 %v346_v45, %v346_v45  ;;  %v355_v59 = vmul.f32 %v347_v49, %v347_v49  ;;  %v356_v62 = vmul.f32 %v348_v54, %v348_v54  ;;  %v357_v1 = vmul.f32 %v349_v58, %v349_v58 }
  0xf3   : > { %v358_v51 = vsel %vm242_vm1, %v350_v46, 0.0  ;;  %v359_v52 = vsel %vm242_vm1, %v351_v47, 0.0  ;;  %v361_v56 = vsel %vm242_vm1, %v352_v48, 0.0  ;;  %v363_v60 = vsel %vm242_vm1, %v353_v50, 0.0 }
  0xf4   : > { %v360_v53 = vadd.f32 %v359_v52, %v358_v51  ;;  %v365_v63 = vsel %vm242_vm1, %v354_v55, 0.0  ;;  %v367_v2 = vsel %vm242_vm1, %v355_v59, 0.0  ;;  %v369_v4 = vsel %vm242_vm1, %v356_v62, 0.0 }
  0xf5   : > { %v371_v6 = vsel %vm242_vm1, %v357_v1, 0.0 }
  0xf6   : > { %v362_v57 = vadd.f32 %v361_v56, %v360_v53 }
  0xf8   : > { %v364_v61 = vadd.f32 %v363_v60, %v362_v57 }
  0xfa   : > { %v366_v0 = vadd.f32 %v365_v63, %v364_v61 }
  0xfc   : > { %v368_v3 = vadd.f32 %v367_v2, %v366_v0 }
  0xfe   : > { %v370_v5 = vadd.f32 %v369_v4, %v368_v3 }
 0x100   : > { %v372_v7 = vadd.f32 %v371_v6, %v370_v5 }
 0x102   : > { %v373_v8 = vrot.slane %v372_v7, 4 }
 0x104   : > { %v374_v9 = vadd.f32 %v373_v8, %v372_v7 }
 0x106   : > { %v375_v10 = vrot.slane %v374_v9, 2 }
 0x108   : > { %v376_v11 = vadd.f32 %v375_v10, %v374_v9 }
 0x10a   : > { %v377_v12 = vrot.slane %v376_v11, 1 }
 0x10c   : > { %v378_v13 = vadd.f32 %v377_v12, %v376_v11 }
 0x10e   : > { %578 = vmatmul.mubr.msk.f32.vlgmr.msra.gmra.mxu1 %vm242_vm1, %v378_v13 }
 0x1ce   : > { %v448_v14 = vpop.f32.mrf.mxu1 }
 0x1cf   : > { %v452_v15 = vmul.f32 0.015625, %v448_v14 }
 0x1d0   : > { %v579_v16 = vpop.f32.mrf.mxu1 }
 0x1d1   : > { %v453_v17 = vadd.f32 1e-05, %v452_v15 }
 0x1d3   : > { %590 = vrsqrt.f32 %v453_v17 }
 0x1e0   : > { %v591_v19 = vpop.eup %590 }
 0x1e1   : > { %v456_v20 = vmul.f32 %v591_v19, %v455_v18  ;;  %v460_v21 = vmul.f32 %v591_v19, %v337_v38 }
 0x1e3   : > { %458 = vst.msk [vmem:[%s226_s11] sm:$0x1] %vm457_vm2, %v456_v20  ;;  %v461_v23 = vmul.f32 %v460_v21, %v455_v18 }
 0x1e5   : > { %v462_v24 = vsub.f32 %v459_v22, %v461_v23 }
 0x1e7   : > { %463 = vst.msk [vmem:[%s229_s16] sm:$0x1] %vm457_vm2, %v462_v24 }
 0x1e8 PF: > { %s16_s18 = sadd.s32 1, %s598_s18  }
 0x1e9   : > { %p13_p4 = scmp.ge.s32.totalorder %s16_s18, 4  }
 0x1eb   :  { %15 = sbr.rel (!%p13_p4) target bundleno = 1 (0x1), region = 78 }

// kernel: preact_bottleneck_forward.8
= control target key start
LH: loop header
LB: loop body
LE: loop exit
PB: predicated region body
PF: predicated region fallthrough
CT: control target
= control target key end

     0   :  { %s660_s18 = smov 0   ;;  %s775_s0 = inlined_call_operand.vmem [shape: f32[2,64,64], index: 0, kind: input, shape index: {}]   ;;  %s776_s1 = inlined_call_operand.vmem [shape: f32[1,64], index: 1, kind: input, shape index: {}]   ;;  %s777_s2 = inlined_call_operand.vmem [shape: f32[1,64], index: 2, kind: input, shape index: {}]   ;;  %s778_s3 = inlined_call_operand.vmem [shape: f32[64,64], index: 3, kind: input, shape index: {}]   ;;  %s779_s4 = inlined_call_operand.vmem [shape: f32[2,1,64], index: 4, kind: output, shape index: {0}]   ;;  %s780_s5 = inlined_call_operand.vmem [shape: f32[2,1,64], index: 5, kind: output, shape index: {1}]  }
   0x1 LB: > { %s540_s19 = sadd.s32 4294967295, %s626_s18   ;;  %p544_p0 = scmp.ge.s32.totalorder %s626_s18, 1  ;;  %s626_s18 = sphi %s660_s18, %s16_s18  }
   0x2   : > { %p190_p1 = scmp.lt.s32.totalorder %s626_s18, 3 }
   0x4   : > { %p191_p2 = pnand %p544_p0, %p190_p1 }
   0x5   : > { %p219_p3 = scmp.lt.s32.totalorder (!%p191_p2), %s540_s19, 1 }
   0x6   : > { %194 = sbr.rel (%p191_p2) target bundleno = 488 (0x1e8), region = 36 }
   0xb   : > { %v245_v0 = vld [vmem:[%s778_s3 + $0x38] sm:$0xff]  ;;  %v628_v1 = vmov 0.0   ;;  %v244_v2 = vld [vmem:[%s778_s3 + $0x30] sm:$0xff]  ;;  %vm629_vm0 = vmmov 0   ;;  %s782_s19 = smov (!%p219_p3, %s540_s19), 1  ;;  %v243_v3 = vld [vmem:[%s778_s3 + $0x28] sm:$0xff]  ;;  %v342_v38 = vlaneseq }
   0xc   : > { %570 = vmatprep.subr.mxu0 %v628_v1  ;;  %586 = vmatprep.mubr.msk.f32.mxu0 %vm629_vm0, %v628_v1  ;;  %s551_s26 = sshll.u32 %s782_s19, 6  ;;  %vm246_vm1 = vcmask 523264   ;;  %v242_v4 = vld [vmem:[%s778_s3 + $0x20] sm:$0xff]  ;;  %v241_v8 = vld [vmem:[%s778_s3 + $0x18] sm:$0xff]  ;;  %v240_v15 = vld [vmem:[%s778_s3 + $0x10] sm:$0xff]  ;;  %s226_s21 = scalar_lea.vmem %s779_s4, %s782_s19  ;;  %vm461_vm2 = vcmask 516096  }
   0xd   : > { %571 = vmatpush3.msra.mxu0 %v245_v0  ;;  %589 = vmatprep.subr.mxu1 %v628_v1  ;;  %s693_s6 = scalar_lea.vmem %s775_s0, %s551_s26  ;;  %v239_v19 = vld [vmem:[%s778_s3 + $0x8] sm:$0xff]  ;;  %v238_v23 = vld [vmem:[%s778_s3] sm:$0xff]  ;;  %v343_v39 = vshrl.u32 %v342_v38, 7  ;;  %s229_s26 = scalar_lea.vmem %s780_s5, %s782_s19 }
   0xe   : > { %572 = vmatprep.subr.mxu0 %v628_v1  ;;  %590 = vmatpush3.msra.mxu1 %v245_v0  ;;  %v696_v5 = vld [vmem:[%s693_s6] sm:$0xff]  ;;  %v699_v6 = vld [vmem:[%s693_s6 + $0x8] sm:$0xff]  ;;  %v702_v7 = vld [vmem:[%s693_s6 + $0x10] sm:$0xff] }
   0xf   : > { %573 = vmatpush3.msra.mxu0 %v244_v2  ;;  %591 = vmatprep.subr.mxu1 %v628_v1  ;;  %v233_v9 = vld [vmem:[%s693_s6 + $0x18] sm:$0xff]  ;;  %v247_v10 = vsel %vm246_vm1, %v696_v5, 0.0  ;;  %v248_v11 = vsel %vm246_vm1, %v699_v6, 0.0  ;;  %v250_v12 = vsel %vm246_vm1, %v702_v7, 0.0  ;;  %v234_v13 = vld [vmem:[%s693_s6 + $0x20] sm:$0xff]  ;;  %v235_v17 = vld [vmem:[%s693_s6 + $0x28] sm:$0xff] }
  0x10   : > { %574 = vmatprep.subr.mxu0 %v628_v1  ;;  %592 = vmatpush3.msra.mxu1 %v244_v2  ;;  %v249_v14 = vadd.f32 %v248_v11, %v247_v10  ;;  %v252_v16 = vsel %vm246_vm1, %v233_v9, 0.0  ;;  %v254_v20 = vsel %vm246_vm1, %v234_v13, 0.0  ;;  %v236_v21 = vld [vmem:[%s693_s6 + $0x30] sm:$0xff]  ;;  %v256_v24 = vsel %vm246_vm1, %v235_v17, 0.0  ;;  %v237_v25 = vld [vmem:[%s693_s6 + $0x38] sm:$0xff] }
  0x11   : > { %575 = vmatpush3.msra.mxu0 %v243_v3  ;;  %593 = vmatprep.subr.mxu1 %v628_v1  ;;  %v258_v27 = vsel %vm246_vm1, %v236_v21, 0.0  ;;  %v260_v29 = vsel %vm246_vm1, %v237_v25, 0.0  ;;  %v344_v40 = vsub.s32 0, %v343_v39 }
  0x12   : > { %576 = vmatprep.subr.mxu0 %v628_v1  ;;  %594 = vmatpush3.msra.mxu1 %v243_v3  ;;  %v251_v18 = vadd.f32 %v250_v12, %v249_v14 }
  0x13   : > { %577 = vmatpush3.msra.mxu0 %v242_v4  ;;  %595 = vmatprep.subr.mxu1 %v628_v1 }
  0x14   : > { %578 = vmatprep.subr.mxu0 %v628_v1  ;;  %596 = vmatpush3.msra.mxu1 %v242_v4  ;;  %v253_v22 = vadd.f32 %v252_v16, %v251_v18 }
  0x15   : > { %579 = vmatpush3.msra.mxu0 %v241_v8  ;;  %597 = vmatprep.subr.mxu1 %v628_v1 }
  0x16   : > { %580 = vmatprep.subr.mxu0 %v628_v1  ;;  %598 = vmatpush3.msra.mxu1 %v241_v8  ;;  %v255_v26 = vadd.f32 %v254_v20, %v253_v22  ;;  %v459_v22 = vld [vmem:[%s776_s1] sm:$0x1] }
  0x17   : > { %581 = vmatpush3.msra.mxu0 %v240_v15  ;;  %599 = vmatprep.subr.mxu1 %v628_v1 }
  0x18   : > { %582 = vmatprep.subr.mxu0 %v628_v1  ;;  %600 = vmatpush3.msra.mxu1 %v240_v15  ;;  %v257_v28 = vadd.f32 %v256_v24, %v255_v26  ;;  %v463_v26 = vld [vmem:[%s777_s2] sm:$0x1] }
  0x19   : > { %583 = vmatpush3.msra.mxu0 %v239_v19  ;;  %601 = vmatprep.subr.mxu1 %v628_v1 }
  0x1a   : > { %584 = vmatprep.subr.mxu0 %v628_v1  ;;  %602 = vmatpush3.msra.mxu1 %v239_v19  ;;  %v259_v30 = vadd.f32 %v258_v27, %v257_v28 }
  0x1b   : > { %585 = vmatpush3.msra.mxu0 %v238_v23  ;;  %603 = vmatprep.subr.mxu1 %v628_v1 }
  0x1c   : > { %604 = vmatpush3.msra.mxu1 %v238_v23  ;;  %605 = vmatprep.mubr.msk.f32.mxu1 %vm629_vm0, %v628_v1  ;;  %v261_v31 = vadd.f32 %v260_v29, %v259_v30 }
  0x1e   : > { %v262_v32 = vrot.slane %v261_v31, 4 }
  0x20   : > { %v263_v33 = vadd.f32 %v262_v32, %v261_v31 }
  0x22   : > { %v264_v34 = vrot.slane %v263_v33, 2 }
  0x24   : > { %v265_v35 = vadd.f32 %v264_v34, %v263_v33 }
  0x26   : > { %v266_v36 = vrot.slane %v265_v35, 1 }
  0x28   : > { %v267_v37 = vadd.f32 %v266_v36, %v265_v35 }
  0x2a   : > { %587 = vmatmul.mubr.msk.f32.vlgmr.msra.gmra.mxu0 %vm246_vm1, %v267_v37 }
  0xea   : > { %v337_v41 = vpop.f32.mrf.mxu0 }
  0xeb   : > { %v341_v42 = vmul.f32 0.0078125, %v337_v41 }
  0xec   : > { %v588_v43 = vpop.f32.mrf.mxu0 }
  0xed   : > { %v345_v44 = vrot.slane %v341_v42, %v344_v40 }
  0xef   : > { %v346_v45 = vsub.f32 %v696_v5, %v345_v44  ;;  %v347_v46 = vsub.f32 %v699_v6, %v345_v44  ;;  %v348_v47 = vsub.f32 %v702_v7, %v345_v44  ;;  %v349_v48 = vsub.f32 %v233_v9, %v345_v44 }
  0xf0   : > { %v350_v49 = vsub.f32 %v234_v13, %v345_v44  ;;  %v351_v53 = vsub.f32 %v235_v17, %v345_v44  ;;  %v352_v58 = vsub.f32 %v236_v21, %v345_v44  ;;  %v353_v62 = vsub.f32 %v237_v25, %v345_v44 }
  0xf1   : > { %v354_v50 = vmul.f32 %v346_v45, %v346_v45  ;;  %v355_v51 = vmul.f32 %v347_v46, %v347_v46  ;;  %v356_v52 = vmul.f32 %v348_v47, %v348_v47  ;;  %v357_v54 = vmul.f32 %v349_v48, %v349_v48 }
  0xf2   : > { %v358_v59 = vmul.f32 %v350_v49, %v350_v49  ;;  %v359_v63 = vmul.f32 %v351_v53, %v351_v53  ;;  %v360_v2 = vmul.f32 %v352_v58, %v352_v58  ;;  %v361_v5 = vmul.f32 %v353_v62, %v353_v62 }
  0xf3   : > { %v362_v55 = vsel %vm246_vm1, %v354_v50, 0.0  ;;  %v363_v56 = vsel %vm246_vm1, %v355_v51, 0.0  ;;  %v365_v60 = vsel %vm246_vm1, %v356_v52, 0.0  ;;  %v367_v0 = vsel %vm246_vm1, %v357_v54, 0.0 }
  0xf4   : > { %v364_v57 = vadd.f32 %v363_v56, %v362_v55  ;;  %v369_v3 = vsel %vm246_vm1, %v358_v59, 0.0  ;;  %v371_v6 = vsel %vm246_vm1, %v359_v63, 0.0  ;;  %v373_v8 = vsel %vm246_vm1, %v360_v2, 0.0 }
  0xf5   : > { %v375_v10 = vsel %vm246_vm1, %v361_v5, 0.0 }
  0xf6   : > { %v366_v61 = vadd.f32 %v365_v60, %v364_v57 }
  0xf8   : > { %v368_v1 = vadd.f32 %v367_v0, %v366_v61 }
  0xfa   : > { %v370_v4 = vadd.f32 %v369_v3, %v368_v1 }
  0xfc   : > { %v372_v7 = vadd.f32 %v371_v6, %v370_v4 }
  0xfe   : > { %v374_v9 = vadd.f32 %v373_v8, %v372_v7 }
 0x100   : > { %v376_v11 = vadd.f32 %v375_v10, %v374_v9 }
 0x102   : > { %v377_v12 = vrot.slane %v376_v11, 4 }
 0x104   : > { %v378_v13 = vadd.f32 %v377_v12, %v376_v11 }
 0x106   : > { %v379_v14 = vrot.slane %v378_v13, 2 }
 0x108   : > { %v380_v15 = vadd.f32 %v379_v14, %v378_v13 }
 0x10a   : > { %v381_v16 = vrot.slane %v380_v15, 1 }
 0x10c   : > { %v382_v17 = vadd.f32 %v381_v16, %v380_v15 }
 0x10e   : > { %606 = vmatmul.mubr.msk.f32.vlgmr.msra.gmra.mxu1 %vm246_vm1, %v382_v17 }
 0x1ce   : > { %v452_v18 = vpop.f32.mrf.mxu1 }
 0x1cf   : > { %v456_v19 = vmul.f32 0.0078125, %v452_v18 }
 0x1d0   : > { %v607_v20 = vpop.f32.mrf.mxu1 }
 0x1d1   : > { %v457_v21 = vadd.f32 1e-05, %v456_v19 }
 0x1d3   : > { %618 = vrsqrt.f32 %v457_v21 }
 0x1e0   : > { %v619_v23 = vpop.eup %618 }
 0x1e1   : > { %v460_v24 = vmul.f32 %v619_v23, %v459_v22  ;;  %v464_v25 = vmul.f32 %v619_v23, %v341_v42 }
 0x1e3   : > { %462 = vst.msk [vmem:[%s226_s21] sm:$0x1] %vm461_vm2, %v460_v24  ;;  %v465_v27 = vmul.f32 %v464_v25, %v459_v22 }
 0x1e5   : > { %v466_v28 = vsub.f32 %v463_v26, %v465_v27 }
 0x1e7   : > { %467 = vst.msk [vmem:[%s229_s26] sm:$0x1] %vm461_vm2, %v466_v28 }
 0x1e8 PF: > { %s16_s18 = sadd.s32 1, %s626_s18  }
 0x1e9   : > { %p13_p4 = scmp.ge.s32.totalorder %s16_s18, 4  }
 0x1eb   :  { %15 = sbr.rel (!%p13_p4) target bundleno = 1 (0x1), region = 78 }

// kernel: preact_bottleneck_forward.9
= control target key start
LH: loop header
LB: loop body
LE: loop exit
PB: predicated region body
PF: predicated region fallthrough
CT: control target
= control target key end

     0   :  { %s812_s15 = smov 0   ;;  %s814_s16 = smov 0   ;;  %s900_s0 = inlined_call_operand.vmem [shape: f32[2,1,64], index: 0, kind: input, shape index: {}]   ;;  %s901_s1 = inlined_call_operand.vmem [shape: f32[2,1,64], index: 1, kind: input, shape index: {}]   ;;  %s902_s2 = inlined_call_operand.vmem [shape: f32[2,64,64], index: 2, kind: input, shape index: {}]   ;;  %s903_s3 = inlined_call_operand.vmem [shape: bf16[64,32], index: 3, kind: input, shape index: {}]   ;;  %s904_s4 = inlined_call_operand.vmem [shape: f32[2,64,32], index: 4, kind: output, shape index: {}]  }
   0x1   :  { %s816_s17 = smov 0  }
   0x2 LB: > { %s33_s18 = sadd.s32 1, %s780_s16  ;;  %p682_p0 = scmp.ge.s32.totalorder %s784_s17, 1  ;;  %s784_s17 = sphi %s816_s17, %s14_s17   ;;  %s780_s16 = sphi %s814_s16, %s906_s16   ;;  %s776_s15 = sphi %s812_s15, %s905_s15  }
   0x3   : > { %p35_p1 = scmp.ge.s32.totalorder %s33_s18, 2  ;;  %p232_p2 = scmp.lt.s32.totalorder %s784_s17, 3 }
   0x5   : > { %s908_s18 = smov (%p35_p1, %s33_s18), 0  ;;  %p233_p3 = pnand %p682_p0, %p232_p2 }
   0x6   : > { %p286_p4 = scmp.lt.s32.totalorder (!%p233_p3), %s776_s15, 1 }
   0x7   : > { %236 = sbr.rel (%p233_p3) target bundleno = 240 (0xf0), region = 36 }
   0xc   : > { %v758_v0 = vld [vmem:[%s903_s3 + $0x18] sm:$0xff]   ;;  %v759_v1 = vld [vmem:[%s903_s3 + $0x10] sm:$0xff]   ;;  %s910_s15 = smov (!%p286_p4, %s776_s15), 1  ;;  %vm332_vm0 = vcmask 261120   ;;  %v760_v2 = vld [vmem:[%s903_s3 + $0x8] sm:$0xff]   ;;  %v786_v4 = vmov 0.0  }
   0xd   : > { %709 = vmatprep.subr.bf16.mxu0 %v758_v0  ;;  %725 = vmatprep.subr.bf16.mxu1 %v758_v0  ;;  %s291_s27 = scalar_lea.vmem %s900_s0, %s910_s15  ;;  %s297_s30 = scalar_lea.vmem %s901_s1, %s910_s15  ;;  %335 = vst.msk [vmem:[#allocation2 + $0x10] sm:$0xff] %vm332_vm0, %v786_v4  ;;  %333 = vst.msk [vmem:[#allocation2] sm:$0xff] %vm332_vm0, %v786_v4  ;;  %v761_v5 = vld [vmem:[%s903_s3] sm:$0xff]   ;;  %vm431_vm1 = vcmask 523264  }
   0xe   : > { %710 = vmatpush3.bf16.msra.mxu0 %v758_v0  ;;  %729 = vmatpush3.bf16.msra.mxu1 %v758_v0  ;;  %s699_s5 = sshll.u32 %s910_s15, 6  ;;  %v687_v3 = vld [vmem:[%s291_s27] ss:$0 sm:$0xff]  ;;  %334 = vst.msk [vmem:[#allocation2 + $0x8] sm:$0xff] %vm332_vm0, %v786_v4  ;;  %336 = vst.msk [vmem:[#allocation2 + $0x18] sm:$0xff] %vm332_vm0, %v786_v4 }
   0xf   : > { %711 = vmatprep.subr.bf16.mxu0 %v759_v1  ;;  %726 = vmatprep.subr.bf16.mxu1 %v759_v1  ;;  %337 = vst.msk [vmem:[#allocation2 + $0x20] sm:$0xff] %vm332_vm0, %v786_v4  ;;  %338 = vst.msk [vmem:[#allocation2 + $0x28] sm:$0xff] %vm332_vm0, %v786_v4  ;;  %s309_s10 = scalar_lea.vmem %s902_s2, %s699_s5  ;;  %v688_v6 = vld [vmem:[%s297_s30] ss:$0 sm:$0xff]  ;;  %s325_s13 = scalar_lea.vmem %s904_s4, %s699_s5 }
  0x10   : > { %339 = vst.msk [vmem:[#allocation2 + $0x30] sm:$0xff] %vm332_vm0, %v786_v4  ;;  %340 = vst.msk [vmem:[#allocation2 + $0x38] sm:$0xff] %vm332_vm0, %v786_v4  ;;  %v341_v7 = vld [vmem:[%s309_s10] sm:$0xff]  ;;  %v342_v8 = vld [vmem:[%s309_s10 + $0x8] sm:$0xff] }
  0x11   : > { %v345_v9 = vld [vmem:[%s309_s10 + $0x20] sm:$0xff]  ;;  %v356_v10 = vmul.f32 %v687_v3, %v341_v7  ;;  %v357_v11 = vmul.f32 %v687_v3, %v342_v8  ;;  %v346_v12 = vld [vmem:[%s309_s10 + $0x28] sm:$0xff]  ;;  %v343_v14 = vld [vmem:[%s309_s10 + $0x10] sm:$0xff] }
  0x12   : > { %712 = vmatpush3.bf16.msra.mxu0 %v759_v1  ;;  %730 = vmatpush3.bf16.msra.mxu1 %v759_v1  ;;  %v360_v13 = vmul.f32 %v687_v3, %v345_v9  ;;  %v344_v15 = vld [vmem:[%s309_s10 + $0x18] sm:$0xff]  ;;  %v361_v16 = vmul.f32 %v687_v3, %v346_v12  ;;  %v358_v17 = vmul.f32 %v687_v3, %v343_v14  ;;  %v347_v19 = vld [vmem:[%s309_s10 + $0x30] sm:$0xff] }
  0x13   : > { %713 = vmatprep.subr.bf16.mxu0 %v760_v2  ;;  %727 = vmatprep.subr.bf16.mxu1 %v760_v2  ;;  %v359_v18 = vmul.f32 %v687_v3, %v344_v15  ;;  %v348_v20 = vld [vmem:[%s309_s10 + $0x38] sm:$0xff]  ;;  %v371_v21 = vadd.f32 %v688_v6, %v356_v10  ;;  %v372_v22 = vadd.f32 %v688_v6, %v357_v11 }
  0x14   : > { %v375_v23 = vadd.f32 %v688_v6, %v360_v13  ;;  %v362_v24 = vmul.f32 %v687_v3, %v347_v19  ;;  %v376_v25 = vadd.f32 %v688_v6, %v361_v16  ;;  %v373_v26 = vadd.f32 %v688_v6, %v358_v17  ;;  %v393_v43 = vld [vmem:[#allocation2 + $0x10] sm:$0xff]  ;;  %v391_v46 = vld [vmem:[#allocation2] sm:$0xff] }
  0x15   : > { %v374_v27 = vadd.f32 %v688_v6, %v359_v18  ;;  %v379_v28 = vmax.f32 %v371_v21, 0.0  ;;  %v380_v29 = vmax.f32 %v372_v22, 0.0  ;;  %v363_v31 = vmul.f32 %v687_v3, %v348_v20  ;;  %v394_v51 = vld [vmem:[#allocation2 + $0x18] sm:$0xff]  ;;  %v392_v57 = vld [vmem:[#allocation2 + $0x8] sm:$0xff] }
  0x16   : > { %714 = vmatpush3.bf16.msra.mxu0 %v760_v2  ;;  %731 = vmatpush3.bf16.msra.mxu1 %v760_v2  ;;  %v383_v30 = vmax.f32 %v375_v23, 0.0  ;;  %v384_v32 = vmax.f32 %v376_v25, 0.0  ;;  %v381_v33 = vmax.f32 %v373_v26, 0.0  ;;  %v377_v35 = vadd.f32 %v688_v6, %v362_v24  ;;  %v395_v50 = vld [vmem:[#allocation2 + $0x20] sm:$0xff]  ;;  %v396_v62 = vld [vmem:[#allocation2 + $0x28] sm:$0xff] }
  0x17   : > { %715 = vmatprep.subr.bf16.mxu0 %v761_v5  ;;  %728 = vmatprep.subr.bf16.mxu1 %v761_v5  ;;  %v382_v34 = vmax.f32 %v374_v27, 0.0  ;;  %v387_v36 = vpack.c.bf16 %v380_v29, %v379_v28  ;;  %v378_v37 = vadd.f32 %v688_v6, %v363_v31  ;;  %v397_v45 = vld [vmem:[#allocation2 + $0x30] sm:$0xff]  ;;  %v398_v56 = vld [vmem:[#allocation2 + $0x38] sm:$0xff] }
  0x18   : > { %v389_v38 = vpack.c.bf16 %v384_v32, %v383_v30  ;;  %v385_v40 = vmax.f32 %v377_v35, 0.0 }
  0x19   : > { %v388_v39 = vpack.c.bf16 %v382_v34, %v381_v33  ;;  %717 = vmatprep.mubr.msk.bf16.mxu0 %vm431_vm1, %v387_v36  ;;  %v386_v41 = vmax.f32 %v378_v37, 0.0 }
  0x1a   : > { %716 = vmatpush3.bf16.msra.mxu0 %v761_v5  ;;  %732 = vmatpush3.bf16.msra.mxu1 %v761_v5 }
  0x1b   : > { %721 = vmatprep.mubr.msk.bf16.mxu1 %vm431_vm1, %v389_v38  ;;  %v390_v42 = vpack.c.bf16 %v386_v41, %v385_v40 }
  0x1d   : > { %718 = vmatmul.mubr.msk.bf16.vlgmr.msra.gmra.mxu0 %vm431_vm1, %v388_v39  ;;  %722 = vmatmul.mubr.msk.bf16.vlgmr.msra.gmra.mxu1 %vm431_vm1, %v390_v42 }
  0xdd   : > { %v719_v44 = vpop.f32.mrf.mxu0  ;;  %v723_v48 = vpop.f32.mrf.mxu1 }
  0xde   : > { %v511_v47 = vadd.f32 %v719_v44, %v393_v43  ;;  %v515_v52 = vadd.f32 %v723_v48, %v397_v45 }
  0xdf   : > { %v478_v49 = vpop.f32.mrf.mxu0  ;;  %v494_v54 = vpop.f32.mrf.mxu1 }
  0xe0   : > { %520 = vst.msk [vmem:[#allocation2 + $0x10] sm:$0xff] %vm332_vm0, %v511_v47  ;;  %v509_v53 = vadd.f32 %v478_v49, %v391_v46  ;;  %524 = vst.msk [vmem:[#allocation2 + $0x30] sm:$0xff] %vm332_vm0, %v515_v52  ;;  %v513_v58 = vadd.f32 %v494_v54, %v395_v50 }
  0xe1   : > { %v720_v55 = vpop.f32.mrf.mxu0  ;;  %v724_v60 = vpop.f32.mrf.mxu1 }
  0xe2   : > { %518 = vst.msk [vmem:[#allocation2] sm:$0xff] %vm332_vm0, %v509_v53  ;;  %v512_v59 = vadd.f32 %v720_v55, %v394_v51  ;;  %522 = vst.msk [vmem:[#allocation2 + $0x20] sm:$0xff] %vm332_vm0, %v513_v58  ;;  %v516_v63 = vadd.f32 %v724_v60, %v398_v56 }
  0xe3   : > { %v481_v61 = vpop.f32.mrf.mxu0  ;;  %v497_v1 = vpop.f32.mrf.mxu1 }
  0xe4   : > { %521 = vst.msk [vmem:[#allocation2 + $0x18] sm:$0xff] %vm332_vm0, %v512_v59  ;;  %v510_v0 = vadd.f32 %v481_v61, %v392_v57  ;;  %525 = vst.msk [vmem:[#allocation2 + $0x38] sm:$0xff] %vm332_vm0, %v516_v63  ;;  %v514_v2 = vadd.f32 %v497_v1, %v396_v62 }
  0xe6   : > { %519 = vst.msk [vmem:[#allocation2 + $0x8] sm:$0xff] %vm332_vm0, %v510_v0  ;;  %523 = vst.msk [vmem:[#allocation2 + $0x28] sm:$0xff] %vm332_vm0, %v514_v2 }
  0xe7   : > { %v531_v3 = vld [vmem:[#allocation2 + $0x10] sm:$0xff] }
  0xe8   : > { %539 = vst.msk [vmem:[%s325_s13 + $0x10] sm:$0xff] %vm332_vm0, %v531_v3  ;;  %v535_v4 = vld [vmem:[#allocation2 + $0x30] sm:$0xff] }
  0xe9   : > { %v529_v5 = vld [vmem:[#allocation2] sm:$0xff]  ;;  %543 = vst.msk [vmem:[%s325_s13 + $0x30] sm:$0xff] %vm332_vm0, %v535_v4 }
  0xea   : > { %537 = vst.msk [vmem:[%s325_s13] sm:$0xff] %vm332_vm0, %v529_v5  ;;  %v533_v6 = vld [vmem:[#allocation2 + $0x20] sm:$0xff] }
  0xeb   : > { %v532_v7 = vld [vmem:[#allocation2 + $0x18] sm:$0xff]  ;;  %541 = vst.msk [vmem:[%s325_s13 + $0x20] sm:$0xff] %vm332_vm0, %v533_v6 }
  0xec   : > { %540 = vst.msk [vmem:[%s325_s13 + $0x18] sm:$0xff] %vm332_vm0, %v532_v7  ;;  %v536_v8 = vld [vmem:[#allocation2 + $0x38] sm:$0xff] }
  0xed   : > { %v530_v9 = vld [vmem:[#allocation2 + $0x8] sm:$0xff]  ;;  %544 = vst.msk [vmem:[%s325_s13 + $0x38] sm:$0xff] %vm332_vm0, %v536_v8 }
  0xee   : > { %538 = vst.msk [vmem:[%s325_s13 + $0x8] sm:$0xff] %vm332_vm0, %v530_v9  ;;  %v534_v10 = vld [vmem:[#allocation2 + $0x28] sm:$0xff] }
  0xef   : > { %542 = vst.msk [vmem:[%s325_s13 + $0x28] sm:$0xff] %vm332_vm0, %v534_v10 }
  0xf0 PF: > { %s14_s17 = sadd.s32 1, %s784_s17   ;;  %s905_s15 = smov %s780_s16 }
  0xf1   : > { %p11_p5 = scmp.ge.s32.totalorder %s14_s17, 4   ;;  %s906_s16 = smov %s908_s18 }
  0xf3   :  { %13 = sbr.rel (!%p11_p5) target bundleno = 2 (0x2), region = 83 }

// kernel: preact_bottleneck_forward.12
= control target key start
LH: loop header
LB: loop body
LE: loop exit
PB: predicated region body
PF: predicated region fallthrough
CT: control target
= control target key end

     0   :  { %s481_s12 = smov 0   ;;  %s483_s13 = smov 0   ;;  %s528_s0 = inlined_call_operand.vmem [shape: f32[2,1,32], index: 0, kind: input, shape index: {}]   ;;  %s529_s1 = inlined_call_operand.vmem [shape: f32[2,1,32], index: 1, kind: input, shape index: {}]   ;;  %s530_s2 = inlined_call_operand.vmem [shape: f32[2,64,32], index: 2, kind: input, shape index: {}]   ;;  %s531_s3 = inlined_call_operand.vmem [shape: f32[2,64,32], index: 3, kind: output, shape index: {}]  }
   0x1   :  { %s485_s14 = smov 0  }
   0x2 LB: > { %s25_s15 = sadd.s32 1, %s455_s13  ;;  %p402_p0 = scmp.ge.s32.totalorder %s459_s14, 1  ;;  %s459_s14 = sphi %s485_s14, %s13_s14   ;;  %s455_s13 = sphi %s483_s13, %s533_s13   ;;  %s451_s12 = sphi %s481_s12, %s532_s12  }
   0x3   : > { %p27_p1 = scmp.ge.s32.totalorder %s25_s15, 2  ;;  %p174_p2 = scmp.lt.s32.totalorder %s459_s14, 3 }
   0x5   : > { %s535_s15 = smov (%p27_p1, %s25_s15), 0  ;;  %p175_p3 = pnand %p402_p0, %p174_p2 }
   0x6   : > { %p212_p4 = scmp.lt.s32.totalorder (!%p175_p3), %s451_s12, 1 }
   0x7   : > { %178 = sbr.rel (%p175_p3) target bundleno = 27 (0x1b), region = 32 }
   0xc   : > { %s537_s12 = smov (!%p212_p4, %s451_s12), 1  ;;  %vm284_vm0 = vcmask 261120  }
   0xd   : > { %s214_s18 = scalar_lea.vmem %s528_s0, %s537_s12  ;;  %s217_s21 = scalar_lea.vmem %s529_s1, %s537_s12 }
   0xe   : > { %s411_s22 = sshll.u32 %s537_s12, 6  ;;  %v407_v0 = vld [vmem:[%s214_s18] ss:$0 sm:$0xff] }
   0xf   : > { %s226_s25 = scalar_lea.vmem %s530_s2, %s411_s22  ;;  %v408_v1 = vld [vmem:[%s217_s21] ss:$0 sm:$0xff]  ;;  %s236_s28 = scalar_lea.vmem %s531_s3, %s411_s22 }
  0x10   : > { %v238_v2 = vld [vmem:[%s226_s25] sm:$0xff]  ;;  %v239_v3 = vld [vmem:[%s226_s25 + $0x8] sm:$0xff]  ;;  %v240_v4 = vld [vmem:[%s226_s25 + $0x10] sm:$0xff] }
  0x11   : > { %v253_v5 = vmul.f32 %v407_v0, %v238_v2  ;;  %v254_v6 = vmul.f32 %v407_v0, %v239_v3  ;;  %v255_v7 = vmul.f32 %v407_v0, %v240_v4  ;;  %v241_v8 = vld [vmem:[%s226_s25 + $0x18] sm:$0xff]  ;;  %v242_v9 = vld [vmem:[%s226_s25 + $0x20] sm:$0xff]  ;;  %v243_v10 = vld [vmem:[%s226_s25 + $0x28] sm:$0xff] }
  0x12   : > { %v256_v11 = vmul.f32 %v407_v0, %v241_v8  ;;  %v257_v12 = vmul.f32 %v407_v0, %v242_v9  ;;  %v258_v13 = vmul.f32 %v407_v0, %v243_v10  ;;  %v244_v14 = vld [vmem:[%s226_s25 + $0x30] sm:$0xff]  ;;  %v245_v15 = vld [vmem:[%s226_s25 + $0x38] sm:$0xff] }
  0x13   : > { %v268_v16 = vadd.f32 %v408_v1, %v253_v5  ;;  %v269_v17 = vadd.f32 %v408_v1, %v254_v6  ;;  %v270_v18 = vadd.f32 %v408_v1, %v255_v7  ;;  %v259_v19 = vmul.f32 %v407_v0, %v244_v14 }
  0x14   : > { %v271_v20 = vadd.f32 %v408_v1, %v256_v11  ;;  %v272_v21 = vadd.f32 %v408_v1, %v257_v12  ;;  %v273_v22 = vadd.f32 %v408_v1, %v258_v13  ;;  %v260_v23 = vmul.f32 %v407_v0, %v245_v15 }
  0x15   : > { %v276_v24 = vmax.f32 %v268_v16, 0.0  ;;  %v277_v25 = vmax.f32 %v269_v17, 0.0  ;;  %v278_v26 = vmax.f32 %v270_v18, 0.0  ;;  %v274_v27 = vadd.f32 %v408_v1, %v259_v19 }
  0x16   : > { %v279_v28 = vmax.f32 %v271_v20, 0.0  ;;  %v280_v29 = vmax.f32 %v272_v21, 0.0  ;;  %v281_v30 = vmax.f32 %v273_v22, 0.0  ;;  %v275_v31 = vadd.f32 %v408_v1, %v260_v23 }
  0x17   : > { %285 = vst.msk [vmem:[%s236_s28] sm:$0xff] %vm284_vm0, %v276_v24  ;;  %286 = vst.msk [vmem:[%s236_s28 + $0x8] sm:$0xff] %vm284_vm0, %v277_v25  ;;  %v282_v32 = vmax.f32 %v274_v27, 0.0 }
  0x18   : > { %287 = vst.msk [vmem:[%s236_s28 + $0x10] sm:$0xff] %vm284_vm0, %v278_v26  ;;  %288 = vst.msk [vmem:[%s236_s28 + $0x18] sm:$0xff] %vm284_vm0, %v279_v28  ;;  %v283_v33 = vmax.f32 %v275_v31, 0.0 }
  0x19   : > { %289 = vst.msk [vmem:[%s236_s28 + $0x20] sm:$0xff] %vm284_vm0, %v280_v29  ;;  %290 = vst.msk [vmem:[%s236_s28 + $0x28] sm:$0xff] %vm284_vm0, %v281_v30 }
  0x1a   : > { %291 = vst.msk [vmem:[%s236_s28 + $0x30] sm:$0xff] %vm284_vm0, %v282_v32  ;;  %292 = vst.msk [vmem:[%s236_s28 + $0x38] sm:$0xff] %vm284_vm0, %v283_v33 }
  0x1b PF: > { %s13_s14 = sadd.s32 1, %s459_s14   ;;  %s532_s12 = smov %s455_s13 }
  0x1c   : > { %p10_p5 = scmp.ge.s32.totalorder %s13_s14, 4   ;;  %s533_s13 = smov %s535_s15 }
  0x1e   :  { %12 = sbr.rel (!%p10_p5) target bundleno = 2 (0x2), region = 68 }

// kernel: preact_bottleneck_forward.14
= control target key start
LH: loop header
LB: loop body
LE: loop exit
PB: predicated region body
PF: predicated region fallthrough
CT: control target
= control target key end

     0   :  { %s590_s18 = smov 0   ;;  %s641_s0 = inlined_call_operand.vmem [shape: f32[2,16,32], index: 0, kind: input, shape index: {}]   ;;  %s642_s1 = inlined_call_operand.vmem [shape: f32[1,32], index: 1, kind: input, shape index: {}]   ;;  %s643_s2 = inlined_call_operand.vmem [shape: f32[1,32], index: 2, kind: input, shape index: {}]   ;;  %s644_s3 = inlined_call_operand.vmem [shape: f32[32,32], index: 3, kind: input, shape index: {}]   ;;  %s645_s4 = inlined_call_operand.vmem [shape: f32[2,1,32], index: 4, kind: output, shape index: {0}]   ;;  %s646_s5 = inlined_call_operand.vmem [shape: f32[2,1,32], index: 5, kind: output, shape index: {1}]  }
   0x1 LB: > { %s494_s19 = sadd.s32 4294967295, %s556_s18   ;;  %p498_p0 = scmp.ge.s32.totalorder %s556_s18, 1  ;;  %s556_s18 = sphi %s590_s18, %s16_s18  }
   0x2   : > { %p190_p1 = scmp.lt.s32.totalorder %s556_s18, 3 }
   0x4   : > { %p191_p2 = pnand %p498_p0, %p190_p1 }
   0x5   : > { %p219_p3 = scmp.lt.s32.totalorder (!%p191_p2), %s494_s19, 1 }
   0x6   : > { %194 = sbr.rel (%p191_p2) target bundleno = 464 (0x1d0), region = 36 }
   0xb   : > { %v235_v0 = vld [vmem:[%s644_s3 + $0x18] sm:$0xff]  ;;  %v558_v1 = vmov 0.0   ;;  %v234_v2 = vld [vmem:[%s644_s3 + $0x10] sm:$0xff]  ;;  %vm559_vm0 = vmmov 0   ;;  %s648_s19 = smov (!%p219_p3, %s494_s19), 1  ;;  %v233_v3 = vld [vmem:[%s644_s3 + $0x8] sm:$0xff]  ;;  %v320_v16 = vlaneseq }
   0xc   : > { %516 = vmatprep.subr.mxu0 %v558_v1  ;;  %524 = vmatprep.mubr.msk.f32.mxu0 %vm559_vm0, %v558_v1  ;;  %s505_s26 = sshll.u32 %s648_s19, 4  ;;  %vm236_vm1 = vcmask 261120   ;;  %v232_v4 = vld [vmem:[%s644_s3] sm:$0xff]  ;;  %s226_s11 = scalar_lea.vmem %s645_s4, %s648_s19  ;;  %vm415_vm2 = vcmask 253952  }
   0xd   : > { %517 = vmatpush3.msra.mxu0 %v235_v0  ;;  %527 = vmatprep.subr.mxu1 %v558_v1  ;;  %s223_s6 = scalar_lea.vmem %s641_s0, %s505_s26  ;;  %v321_v17 = vshrl.u32 %v320_v16, 7  ;;  %v413_v40 = vld [vmem:[%s642_s1] sm:$0x1]  ;;  %s229_s16 = scalar_lea.vmem %s646_s5, %s648_s19 }
   0xe   : > { %518 = vmatprep.subr.mxu0 %v558_v1  ;;  %528 = vmatpush3.msra.mxu1 %v235_v0  ;;  %v230_v5 = vld [vmem:[%s223_s6] sm:$0xff]  ;;  %v231_v6 = vld [vmem:[%s223_s6 + $0x8] sm:$0xff] }
   0xf   : > { %519 = vmatpush3.msra.mxu0 %v234_v2  ;;  %529 = vmatprep.subr.mxu1 %v558_v1  ;;  %v237_v7 = vsel %vm236_vm1, %v230_v5, 0.0  ;;  %v238_v8 = vsel %vm236_vm1, %v231_v6, 0.0  ;;  %v322_v18 = vsub.s32 0, %v321_v17  ;;  %v417_v44 = vld [vmem:[%s643_s2] sm:$0x1] }
  0x10   : > { %520 = vmatprep.subr.mxu0 %v558_v1  ;;  %530 = vmatpush3.msra.mxu1 %v234_v2  ;;  %v239_v9 = vadd.f32 %v238_v8, %v237_v7 }
  0x11   : > { %521 = vmatpush3.msra.mxu0 %v233_v3  ;;  %531 = vmatprep.subr.mxu1 %v558_v1 }
  0x12   : > { %522 = vmatprep.subr.mxu0 %v558_v1  ;;  %532 = vmatpush3.msra.mxu1 %v233_v3  ;;  %v240_v10 = vrot.slane %v239_v9, 4 }
  0x13   : > { %523 = vmatpush3.msra.mxu0 %v232_v4  ;;  %533 = vmatprep.subr.mxu1 %v558_v1 }
  0x14   : > { %534 = vmatpush3.msra.mxu1 %v232_v4  ;;  %535 = vmatprep.mubr.msk.f32.mxu1 %vm559_vm0, %v558_v1  ;;  %v241_v11 = vadd.f32 %v240_v10, %v239_v9 }
  0x16   : > { %v242_v12 = vrot.slane %v241_v11, 2 }
  0x18   : > { %v243_v13 = vadd.f32 %v242_v12, %v241_v11 }
  0x1a   : > { %v244_v14 = vrot.slane %v243_v13, 1 }
  0x1c   : > { %v245_v15 = vadd.f32 %v244_v14, %v243_v13 }
  0x1e   : > { %525 = vmatmul.mubr.msk.f32.vlgmr.msra.gmra.mxu0 %vm236_vm1, %v245_v15 }
  0xde   : > { %v315_v19 = vpop.f32.mrf.mxu0 }
  0xdf   : > { %v319_v20 = vmul.f32 0.0625, %v315_v19 }
  0xe0   : > { %v526_v21 = vpop.f32.mrf.mxu0 }
  0xe1   : > { %v323_v22 = vrot.slane %v319_v20, %v322_v18 }
  0xe3   : > { %v324_v23 = vsub.f32 %v230_v5, %v323_v22  ;;  %v325_v24 = vsub.f32 %v231_v6, %v323_v22 }
  0xe5   : > { %v326_v25 = vmul.f32 %v324_v23, %v324_v23  ;;  %v327_v26 = vmul.f32 %v325_v24, %v325_v24 }
  0xe7   : > { %v328_v27 = vsel %vm236_vm1, %v326_v25, 0.0  ;;  %v329_v28 = vsel %vm236_vm1, %v327_v26, 0.0 }
  0xe8   : > { %v330_v29 = vadd.f32 %v329_v28, %v328_v27 }
  0xea   : > { %v331_v30 = vrot.slane %v330_v29, 4 }
  0xec   : > { %v332_v31 = vadd.f32 %v331_v30, %v330_v29 }
  0xee   : > { %v333_v32 = vrot.slane %v332_v31, 2 }
  0xf0   : > { %v334_v33 = vadd.f32 %v333_v32, %v332_v31 }
  0xf2   : > { %v335_v34 = vrot.slane %v334_v33, 1 }
  0xf4   : > { %v336_v35 = vadd.f32 %v335_v34, %v334_v33 }
  0xf6   : > { %536 = vmatmul.mubr.msk.f32.vlgmr.msra.gmra.mxu1 %vm236_vm1, %v336_v35 }
 0x1b6   : > { %v406_v36 = vpop.f32.mrf.mxu1 }
 0x1b7   : > { %v410_v37 = vmul.f32 0.0625, %v406_v36 }
 0x1b8   : > { %v537_v38 = vpop.f32.mrf.mxu1 }
 0x1b9   : > { %v411_v39 = vadd.f32 1e-05, %v410_v37 }
 0x1bb   : > { %548 = vrsqrt.f32 %v411_v39 }
 0x1c8   : > { %v549_v41 = vpop.eup %548 }
 0x1c9   : > { %v414_v42 = vmul.f32 %v549_v41, %v413_v40  ;;  %v418_v43 = vmul.f32 %v549_v41, %v319_v20 }
 0x1cb   : > { %416 = vst.msk [vmem:[%s226_s11] sm:$0x1] %vm415_vm2, %v414_v42  ;;  %v419_v45 = vmul.f32 %v418_v43, %v413_v40 }
 0x1cd   : > { %v420_v46 = vsub.f32 %v417_v44, %v419_v45 }
 0x1cf   : > { %421 = vst.msk [vmem:[%s229_s16] sm:$0x1] %vm415_vm2, %v420_v46 }
 0x1d0 PF: > { %s16_s18 = sadd.s32 1, %s556_s18  }
 0x1d1   : > { %p13_p4 = scmp.ge.s32.totalorder %s16_s18, 4  }
 0x1d3   :  { %15 = sbr.rel (!%p13_p4) target bundleno = 1 (0x1), region = 78 }

// kernel: preact_bottleneck_forward.13
= control target key start
LH: loop header
LB: loop body
LE: loop exit
PB: predicated region body
PF: predicated region fallthrough
CT: control target
= control target key end

     0   :  { %s965_s15 = smov 0   ;;  %s967_s16 = smov 0   ;;  %s1070_s0 = inlined_call_operand.vmem [shape: f32[2,1,288], index: 0, kind: input, shape index: {}]   ;;  %s1071_s1 = inlined_call_operand.vmem [shape: f32[2,1,288], index: 1, kind: input, shape index: {}]   ;;  %s1072_s2 = inlined_call_operand.vmem [shape: f32[2,16,288], index: 2, kind: input, shape index: {}]   ;;  %s1073_s3 = inlined_call_operand.vmem [shape: bf16[288,32], index: 3, kind: input, shape index: {}]   ;;  %s1074_s4 = inlined_call_operand.vmem [shape: f32[2,16,32], index: 4, kind: output, shape index: {}]  }
   0x1   :  { %s969_s17 = smov 0  }
   0x2 LB: > { %s33_s18 = sadd.s32 1, %s932_s16  ;;  %p809_p0 = scmp.ge.s32.totalorder %s936_s17, 1  ;;  %s936_s17 = sphi %s969_s17, %s14_s17   ;;  %s932_s16 = sphi %s967_s16, %s1076_s16   ;;  %s928_s15 = sphi %s965_s15, %s1075_s15  }
   0x3   : > { %p35_p1 = scmp.ge.s32.totalorder %s33_s18, 2  ;;  %p241_p2 = scmp.lt.s32.totalorder %s936_s17, 3 }
   0x5   : > { %s1078_s18 = smov (%p35_p1, %s33_s18), 0  ;;  %p242_p3 = pnand %p809_p0, %p241_p2 }
   0x6   : > { %p302_p4 = scmp.lt.s32.totalorder (!%p242_p3), %s928_s15, 1 }
   0x7   : > { %245 = sbr.rel (%p242_p3) target bundleno = 259 (0x103), region = 36 }
   0xc   : > { %v896_v0 = vld [vmem:[%s1073_s3 + $0x78] sm:$0xff]   ;;  %v938_v2 = vmov 0.0   ;;  %v898_v3 = vld [vmem:[%s1073_s3 + $0x70] sm:$0xff]   ;;  %vm939_vm0 = vmmov 0   ;;  %vm356_vm1 = vcmask 261120   ;;  %v900_v5 = vld [vmem:[%s1073_s3 + $0x68] sm:$0xff]   ;;  %v367_v6 = vlaneseq }
   0xd   : > { %v897_v1 = vld [vmem:[%s1073_s3 + $0x38] sm:$0xff]   ;;  %860 = vmatprep.subr.bf16.mxu1 %v938_v2  ;;  %835 = vmatprep.subr.bf16.mxu0 %v896_v0  ;;  %v899_v4 = vld [vmem:[%s1073_s3 + $0x30] sm:$0xff]   ;;  %357 = vst.msk [vmem:[#allocation2] sm:$0xff] %vm356_vm1, %v938_v2  ;;  %358 = vst.msk [vmem:[#allocation2 + $0x8] sm:$0xff] %vm356_vm1, %v938_v2  ;;  %s1080_s15 = smov (!%p302_p4, %s928_s15), 1 }
   0xe   : > { %864 = vmatprep.mubr.msk.bf16.mxu1 %vm939_vm0, %v938_v2  ;;  %836 = vmatpush3.bf16.msra.mxu0 %v897_v1  ;;  %v901_v7 = vld [vmem:[%s1073_s3 + $0x28] sm:$0xff]   ;;  %v902_v8 = vld [vmem:[%s1073_s3 + $0x60] sm:$0xff]   ;;  %v368_v9 = vshrl.u32 %v367_v6, 7  ;;  %s868_s9 = smul.u32 3, %s1080_s15  ;;  %v904_v11 = vld [vmem:[%s1073_s3 + $0x58] sm:$0xff]   ;;  %s834_s22 = sshll.u32 %s1080_s15, 4 }
   0xf   : > { %837 = vmatprep.subr.bf16.mxu0 %v898_v3  ;;  %v903_v10 = vld [vmem:[%s1073_s3 + $0x20] sm:$0xff]   ;;  %s869_s12 = smul.u32 48, %s1080_s15  ;;  %v908_v12 = vld [vmem:[%s1073_s3 + $0x88] sm:$0xff]   ;;  %v905_v14 = vld [vmem:[%s1073_s3 + $0x18] sm:$0xff]  }
  0x10   : > { %v377_v13 = vsub.s32 2, %v368_v9  ;;  %861 = vmatpush3.bf16.msra.mxu1 %v908_v12  ;;  %v373_v15 = vsub.s32 1, %v368_v9  ;;  %v911_v16 = vld [vmem:[%s1073_s3 + $0x80] sm:$0xff]   ;;  %s308_s25 = scalar_lea.vmem %s1070_s0, %s868_s9  ;;  %v369_v17 = vsub.s32 0, %v368_v9  ;;  %v906_v18 = vld [vmem:[%s1073_s3 + $0x50] sm:$0xff]   ;;  %s317_s7 = scalar_lea.vmem %s1071_s1, %s868_s9  ;;  %v909_v29 = vld [vmem:[%s1073_s3 + $0x48] sm:$0xff]  }
  0x11   : > { %862 = vmatprep.subr.bf16.mxu1 %v938_v2  ;;  %s332_s28 = scalar_lea.vmem %s1072_s2, %s869_s12  ;;  %v907_v19 = vld [vmem:[%s1073_s3 + $0x10] sm:$0xff]   ;;  %v365_v22 = vld [vmem:[%s308_s25] sm:$0x7]  ;;  %v910_v41 = vld [vmem:[%s1073_s3 + $0x8] sm:$0xff]   ;;  %s349_s25 = scalar_lea.vmem %s1074_s4, %s834_s22 }
  0x12   : > { %838 = vmatpush3.bf16.msra.mxu0 %v899_v4  ;;  %v361_v20 = vld [vmem:[%s332_s28 + $0x10] sm:$0xff]  ;;  %v364_v21 = vld [vmem:[%s332_s28 + $0x28] sm:$0xff]  ;;  %v378_v23 = vrot.slane %v365_v22, %v377_v13  ;;  %v388_v24 = vld [vmem:[%s317_s7] sm:$0x7]  ;;  %v374_v27 = vrot.slane %v365_v22, %v373_v15  ;;  %v370_v28 = vrot.slane %v365_v22, %v369_v17 }
  0x13   : > { %839 = vmatprep.subr.bf16.mxu0 %v900_v5  ;;  %v360_v25 = vld [vmem:[%s332_s28 + $0x8] sm:$0xff]  ;;  %v363_v26 = vld [vmem:[%s332_s28 + $0x20] sm:$0xff]  ;;  %v401_v30 = vrot.slane %v388_v24, %v377_v13  ;;  %v397_v31 = vrot.slane %v388_v24, %v373_v15  ;;  %v362_v33 = vld [vmem:[%s332_s28 + $0x18] sm:$0xff]  ;;  %v393_v34 = vrot.slane %v388_v24, %v369_v17 }
  0x14   : > { %863 = vmatpush3.bf16.msra.mxu1 %v911_v16  ;;  %v359_v32 = vld [vmem:[%s332_s28] sm:$0xff]  ;;  %v384_v35 = vmul.f32 %v378_v23, %v361_v20  ;;  %v387_v36 = vmul.f32 %v378_v23, %v364_v21  ;;  %v383_v37 = vmul.f32 %v374_v27, %v360_v25  ;;  %v386_v38 = vmul.f32 %v374_v27, %v363_v26 }
  0x15   : > { %v382_v39 = vmul.f32 %v370_v28, %v359_v32  ;;  %v385_v40 = vmul.f32 %v370_v28, %v362_v33  ;;  %v912_v46 = vld [vmem:[%s1073_s3 + $0x40] sm:$0xff]  }
  0x16   : > { %840 = vmatpush3.bf16.msra.mxu0 %v901_v7  ;;  %v407_v42 = vadd.f32 %v401_v30, %v384_v35  ;;  %v410_v43 = vadd.f32 %v401_v30, %v387_v36  ;;  %v406_v44 = vadd.f32 %v397_v31, %v383_v37  ;;  %v409_v45 = vadd.f32 %v397_v31, %v386_v38  ;;  %v913_v55 = vld [vmem:[%s1073_s3] sm:$0xff]  }
  0x17   : > { %841 = vmatprep.subr.bf16.mxu0 %v902_v8  ;;  %v405_v47 = vadd.f32 %v393_v34, %v382_v39  ;;  %v408_v48 = vadd.f32 %v393_v34, %v385_v40  ;;  %v420_v2 = vld [vmem:[#allocation2] sm:$0xff]  ;;  %v421_v8 = vld [vmem:[#allocation2 + $0x8] sm:$0xff] }
  0x18   : > { %v413_v49 = vmax.f32 %v407_v42, 0.0  ;;  %v416_v50 = vmax.f32 %v410_v43, 0.0  ;;  %v412_v51 = vmax.f32 %v406_v44, 0.0  ;;  %v415_v52 = vmax.f32 %v409_v45, 0.0 }
  0x19   : > { %v411_v53 = vmax.f32 %v405_v47, 0.0  ;;  %v414_v54 = vmax.f32 %v408_v48, 0.0 }
  0x1a   : > { %842 = vmatpush3.bf16.msra.mxu0 %v903_v10  ;;  %v419_v56 = vpack.c.bf16 %v416_v50, %v413_v49  ;;  %v418_v57 = vpack.c.bf16 %v415_v52, %v412_v51 }
  0x1b   : > { %843 = vmatprep.subr.bf16.mxu0 %v904_v11  ;;  %v417_v58 = vpack.c.bf16 %v414_v54, %v411_v53 }
  0x1c   : > { %865 = vmatmul.mubr.msk.bf16.vlgmr.msra.gmra.mxu1 %vm356_vm1, %v419_v56  ;;  %602 = vmatprep.mubr.bf16.mxu0 %v418_v57 }
  0x1e   : > { %844 = vmatpush3.bf16.msra.mxu0 %v905_v14 }
  0x1f   : > { %845 = vmatprep.subr.bf16.mxu0 %v906_v18 }
  0x22   : > { %846 = vmatpush3.bf16.msra.mxu0 %v907_v19 }
  0x23   : > { %847 = vmatprep.subr.bf16.mxu0 %v909_v29 }
  0x26   : > { %848 = vmatpush3.bf16.msra.mxu0 %v910_v41 }
  0x27   : > { %849 = vmatprep.subr.bf16.mxu0 %v912_v46 }
  0x2a   : > { %850 = vmatpush3.bf16.msra.mxu0 %v913_v55 }
  0x2d   : > { %603 = vmatmul.mubr.bf16.vlgmr.msra.gmra.mxu0 %v417_v58 }
  0xdc   : > { %v645_v59 = vpop.f32.mrf.mxu1 }
  0xde   : > { %v866_v60 = vpop.f32.mrf.mxu1 }
  0xe0   : > { %v648_v61 = vpop.f32.mrf.mxu1 }
  0xe2   : > { %v867_v63 = vpop.f32.mrf.mxu1 }
  0xed   : > { %v851_v62 = vpop.f32.mrf.mxu0 }
  0xef   : > { %v852_v0 = vpop.f32.mrf.mxu0 }
  0xf0   : > { %v853_v1 = vadd.f32 %v852_v0, %v851_v62 }
  0xf1   : > { %v854_v3 = vpop.f32.mrf.mxu0 }
  0xf2   : > { %v646_v4 = vadd.f32 %v853_v1, %v645_v59 }
  0xf3   : > { %v855_v5 = vpop.f32.mrf.mxu0 }
  0xf4   : > { %v652_v6 = vadd.f32 %v646_v4, %v420_v2  ;;  %v856_v7 = vadd.f32 %v855_v5, %v854_v3 }
  0xf6   : > { %654 = vst.msk [vmem:[#allocation2] sm:$0xff] %vm356_vm1, %v652_v6  ;;  %v649_v9 = vadd.f32 %v856_v7, %v648_v61 }
  0xf8   : > { %v653_v10 = vadd.f32 %v649_v9, %v421_v8 }
  0xfa   : > { %655 = vst.msk [vmem:[#allocation2 + $0x8] sm:$0xff] %vm356_vm1, %v653_v10 }
  0xfd   : > { %v659_v11 = vld [vmem:[#allocation2] sm:$0xff] }
  0xfe   : > { %661 = vst.msk [vmem:[%s349_s25] sm:$0xff] %vm356_vm1, %v659_v11 }
 0x101   : > { %v660_v12 = vld [vmem:[#allocation2 + $0x8] sm:$0xff] }
 0x102   : > { %662 = vst.msk [vmem:[%s349_s25 + $0x8] sm:$0xff] %vm356_vm1, %v660_v12 }
 0x103 PF: > { %s14_s17 = sadd.s32 1, %s936_s17   ;;  %s1075_s15 = smov %s932_s16 }
 0x104   : > { %p11_p5 = scmp.ge.s32.totalorder %s14_s17, 4   ;;  %s1076_s16 = smov %s1078_s18 }
 0x106   :  { %13 = sbr.rel (!%p11_p5) target bundleno = 2 (0x2), region = 83 }

// kernel: preact_bottleneck_forward.15
= control target key start
LH: loop header
LB: loop body
LE: loop exit
PB: predicated region body
PF: predicated region fallthrough
CT: control target
= control target key end

     0   :  { %10 = vsyncpa [#allocation4], 0  ;;  %s984_s0 = inlined_call_operand.vmem [shape: f32[2,1,32], index: 0, kind: input, shape index: {}]   ;;  %s985_s1 = inlined_call_operand.vmem [shape: f32[2,1,32], index: 1, kind: input, shape index: {}]   ;;  %s986_s2 = inlined_call_operand.vmem [shape: f32[2,16,32], index: 2, kind: input, shape index: {}]   ;;  %s987_s3 = inlined_call_operand.vmem [shape: bf16[32,128], index: 3, kind: input, shape index: {}]   ;;  %s988_s4 = inlined_call_operand.vmem [shape: f32[2,16,128], index: 4, kind: input, shape index: {}]   ;;  %s989_s5 = inlined_call_operand.hbm [shape: f32[2,16,128], index: 5, kind: output, shape index: {}]  }
   0x1   :  { %12 = vsyncpa [#allocation4 + $0x1], 0  ;;  %s855_s18 = smov 0   ;;  %s857_s19 = smov 0  }
   0x2   :  { %s859_s20 = smov 0   ;;  %s861_s21 = smov 0  }
   0x3   :  { %s863_s22 = smov 0   ;;  %s865_s23 = smov 0  }
   0x4 LB: > { %s646_s24 = sadd.s32 4294967295, %s818_s23   ;;  %s647_s25 = sadd.s32 4294967294, %s818_s23   ;;  %s818_s23 = sphi %s865_s23, %s18_s23   ;;  %s814_s22 = sphi %s863_s22, %s996_s22   ;;  %s810_s21 = sphi %s861_s21, %s995_s21   ;;  %s806_s20 = sphi %s859_s20, %s994_s20   ;;  %s802_s19 = sphi %s857_s19, %s993_s19   ;;  %s798_s18 = sphi %s855_s18, %s992_s18  }
   0x5   : > { %s37_s26 = sadd.s32 1, %s814_s22  ;;  %s186_s27 = sadd.s32 1, %s806_s20 }
   0x6   : > { %p39_p0 = scmp.ge.s32.totalorder %s37_s26, 2  ;;  %p196_p1 = scmp.ne.s32.totalorder %s806_s20, %s802_s19 }
   0x7   : > { %p197_p2 = scmp.eq.s32.totalorder %s646_s24, 1  ;;  %p202_p3 = scmp.ne.s32.totalorder %s802_s19, %s798_s18 }
   0x8   : > { %s998_s26 = smov (%p39_p0, %s37_s26), 0  ;;  %p203_p5 = scmp.eq.s32.totalorder %s647_s25, 1 }
   0x9   : > { %p895_p4 = por %p197_p2, %p196_p1  ;;  %s181_s29 = ssub.s32 %s814_s22, %s998_s26 }
   0xa   : > { %p651_p6 = scmp.ge.s32.totalorder %s818_s23, 1  ;;  %p184_p7 = scmp.eq.s32.totalorder %s181_s29, 0 }
   0xb   : > { %p902_p8 = por %p203_p5, %p202_p3  ;;  %p277_p9 = scmp.lt.s32.totalorder %s818_s23, 3 }
   0xc   : > { %s908_s6 = scalar_select %p184_p7, %s806_s20, %s186_s27  }
   0xd   : > { %p278_p10 = pnand %p651_p6, %p277_p9 }
   0xe   : > { %p338_p11 = scmp.lt.s32.totalorder (!%p278_p10), %s810_s21, 1  ;;  %s335_s7 = sand.u32 (!%p278_p10), 1, %s802_s19  }
   0xf   : > { %281 = sbr.rel (%p278_p10) target bundleno = 247 (0xf7), region = 40  ;;  %s822_s25 = smov (!%p278_p10), [#allocation3]  }
  0x10   : > { %s746_s27 = sshll.u32 (!%p278_p10), %s822_s25, 4  ;;  %s747_s27 = int_to_ptr.vmem [resolvable:$false] %s746_s27 }
  0x14   : > { %v740_v0 = vld [vmem:[%s987_s3 + $0x8] sm:$0xff]   ;;  %v820_v1 = vmov 0.0   ;;  %v741_v2 = vld [vmem:[%s987_s3] sm:$0xff]   ;;  %vm821_vm0 = vmmov 0   ;;  %s339_s11 = scalar_select %p338_p11, %s810_s21, 1  ;;  %vm428_vm1 = vcmask 261120  }
  0x15   : > { %673 = vmatprep.subr.bf16.mxu0 %v820_v1  ;;  %677 = vmatprep.mubr.msk.bf16.mxu0 %vm821_vm0, %v820_v1 }
  0x16   : > { %674 = vmatpush3.bf16.msra.mxu0 %v740_v0  ;;  %s343_s14 = scalar_lea.vmem %s984_s0, %s339_s11  ;;  %s349_s17 = scalar_lea.vmem %s985_s1, %s339_s11 }
  0x17   : > { %675 = vmatprep.subr.bf16.mxu0 %v820_v1  ;;  %s667_s24 = sshll.u32 %s339_s11, 4  ;;  %v657_v3 = vld [vmem:[%s343_s14] ss:$0 sm:$0xff]  ;;  %s652_s11 = sshll.u32 %s335_s7, 4 }
  0x18   : > { %s361_s29 = scalar_lea.vmem %s986_s2, %s667_s24  ;;  %v658_v6 = vld [vmem:[%s349_s17] ss:$0 sm:$0xff]  ;;  %s377_s10 = scalar_lea.vmem %s988_s4, %s667_s24 }
  0x19   : > { %v387_v4 = vld [vmem:[%s361_s29] sm:$0xff]  ;;  %v388_v5 = vld [vmem:[%s361_s29 + $0x8] sm:$0xff]  ;;  %s337_s12 = scalar_lea.vmem [#allocation3], %s652_s11  ;;  %s669_s14 = sshll.u32 %s810_s21, 8 }
  0x1a   : > { %676 = vmatpush3.bf16.msra.mxu0 %v741_v2  ;;  %v396_v7 = vmul.f32 %v657_v3, %v387_v4  ;;  %v397_v8 = vmul.f32 %v657_v3, %v388_v5  ;;  %v482_v14 = vld [vmem:[%s377_s10] sm:$0xff]  ;;  %s504_s13 = sshll.u32 %s337_s12, 4  ;;  %v483_v18 = vld [vmem:[%s377_s10 + $0x8] sm:$0xff]  ;;  %s937_s17 = scalar_lea.hbm %s989_s5, %s669_s14  ;;  %s932_s13 = int_to_ptr.vmem [resolvable:$true] %s504_s13 }
  0x1b   : > { %s939_s24 = scalar_lea.sflag [#allocation4], %s335_s7  ;;  %s742_s21 = scalar_lea.vmem %s932_s13, 256 }
  0x1c   : > { %v405_v9 = vadd.f32 %v658_v6, %v396_v7  ;;  %v406_v10 = vadd.f32 %v658_v6, %v397_v8  ;;  %p743_p12 = scmp.ne.s32.totalorder %s932_s13, %s742_s21  ;;  %s748_s29 = scalar_lea.vmem %s747_s27, 512 }
  0x1d   : > { %p749_p1 = scmp.lt.s32.totalorder %s932_s13, %s747_s27  ;;  %p750_p2 = scmp.lt.s32.totalorder %s748_s29, %s742_s21 }
  0x1e   : > { %v407_v11 = vmax.f32 %v405_v9, 0.0  ;;  %v408_v12 = vmax.f32 %v406_v10, 0.0  ;;  %p744_p13 = pnand %p743_p12, %p895_p4 }
  0x1f   : > { %p751_p3 = por %p750_p2, %p749_p1 }
  0x20   : > { %v409_v13 = vpack.c.bf16 %v408_v12, %v407_v11  ;;  %p745_p0 = pneg %p744_p13 }
  0x22   : > { %678 = vmatmul.mubr.msk.bf16.vlgmr.msra.gmra.mxu0 %vm428_vm1, %v409_v13  ;;  %p752_p5 = pnand %p751_p3, %p745_p0 }
  0xe2   : > { %v466_v15 = vpop.f32.mrf.mxu0 }
  0xe3   : > { %v484_v16 = vadd.f32 %v482_v14, %v466_v15 }
  0xe4   : > { %v679_v17 = vpop.f32.mrf.mxu0 }
  0xe5   : > { %486 = vst [vmem:[%s337_s12] sm:$0xff] %v484_v16 }
  0xe6   : > { %v469_v19 = vpop.f32.mrf.mxu0 }
  0xe7   : > { %v485_v20 = vadd.f32 %v483_v18, %v469_v19 }
  0xe8   : > { %v680_v21 = vpop.f32.mrf.mxu0 }
  0xe9   : > { %487 = vst [vmem:[%s337_s12 + $0x8] sm:$0xff] %v485_v20 }
  0xea   : > { %755 = shalt.err (!%p752_p5)
}
  0xeb   : > { %s756_s7 = scalar_lea.hbm %s937_s17, 256  ;;  %s760_s10 = scalar_lea.hbm %s989_s5, 512 }
  0xec   : > { %p757_p6 = scmp.ne.s32.totalorder %s937_s17, %s756_s7  ;;  %p761_p10 = scmp.lt.s32.totalorder %s937_s17, %s989_s5 }
  0xed   : > { %p762_p11 = scmp.lt.s32.totalorder %s760_s10, %s756_s7 }
  0xee   : > { %p758_p7 = pnand %p757_p6, %p895_p4 }
  0xef   : > { %p763_p12 = por %p762_p11, %p761_p10 }
  0xf0   : > { %p759_p9 = pneg %p758_p7 }
  0xf2   : > { %p764_p13 = pnand %p763_p12, %p759_p9 }
  0xf4   : > { %767 = shalt.err (!%p764_p13)
}
  0xf5   : > { %s823_s14 = smov 128   ;;  %s824_s15 = smov 8  }
  0xf6   : > { %681 = dma.vmem_to_hbm [thread:$0]  (%p895_p4), %s932_s13, 256, %s937_s17, %s939_s24, %s823_s14, %s823_s14, %s824_s15  }
  0xf7 PF: > { %p687_p0 = scmp.ge.s32.totalorder %s818_s23, 2  ;;  %s519_s16 = sand.u32 1, %s798_s18  }
  0xf8   : > { %s520_s21 = scalar_lea.sflag [#allocation4], %s519_s16 }
  0xf9   : > { %p684_p1 = pnand %p687_p0, %p902_p8 }
  0xfb   : > { %p685_p2 = pneg %p684_p1 }
  0xfd   : > { %793 = dma.done.wait (%p685_p2), %s520_s21, 256  }
  0xfe   : > { %795 = vsyncadd (%p685_p2), %s520_s21, 4294967040  ;;  %s18_s23 = sadd.s32 1, %s818_s23   ;;  %s992_s18 = smov %s802_s19 }
  0xff   : > { %p15_p3 = scmp.ge.s32.totalorder %s18_s23, 4   ;;  %s993_s19 = smov %s806_s20 }
 0x100   : > { %s994_s20 = smov %s908_s6  ;;  %s995_s21 = smov %s814_s22 }
 0x101   : > { %s996_s22 = smov %s998_s26  ;;  %17 = sbr.rel (!%p15_p3) target bundleno = 4 (0x4), region = 95 }
 0x106   :  { %525 = vsyncpa [#allocation4], 1 }
 0x107   :  { %527 = vsyncpa [#allocation4 + $0x1], 1 }

// kernel: preact_bottleneck_forward.10
= control target key start
LH: loop header
LB: loop body
LE: loop exit
PB: predicated region body
PF: predicated region fallthrough
CT: control target
= control target key end

     0   :  { %s698_s15 = smov 0   ;;  %s700_s16 = smov 0   ;;  %s749_s0 = inlined_call_operand.vmem [shape: f32[2,1,64], index: 0, kind: input, shape index: {}]   ;;  %s750_s1 = inlined_call_operand.vmem [shape: f32[2,1,64], index: 1, kind: input, shape index: {}]   ;;  %s751_s2 = inlined_call_operand.vmem [shape: f32[2,16,64], index: 2, kind: input, shape index: {}]   ;;  %s752_s3 = inlined_call_operand.vmem [shape: bf16[64,128], index: 3, kind: input, shape index: {}]   ;;  %s753_s4 = inlined_call_operand.vmem [shape: f32[2,16,128], index: 4, kind: output, shape index: {}]  }
   0x1   :  { %s702_s17 = smov 0  }
   0x2 LB: > { %s33_s18 = sadd.s32 1, %s665_s16  ;;  %p584_p0 = scmp.ge.s32.totalorder %s669_s17, 1  ;;  %s669_s17 = sphi %s702_s17, %s14_s17   ;;  %s665_s16 = sphi %s700_s16, %s755_s16   ;;  %s661_s15 = sphi %s698_s15, %s754_s15  }
   0x3   : > { %p35_p1 = scmp.ge.s32.totalorder %s33_s18, 2  ;;  %p232_p2 = scmp.lt.s32.totalorder %s669_s17, 3 }
   0x5   : > { %s757_s18 = smov (%p35_p1, %s33_s18), 0  ;;  %p233_p3 = pnand %p584_p0, %p232_p2 }
   0x6   : > { %p286_p4 = scmp.lt.s32.totalorder (!%p233_p3), %s661_s15, 1 }
   0x7   : > { %236 = sbr.rel (%p233_p3) target bundleno = 228 (0xe4), region = 36 }
   0xc   : > { %v643_v0 = vld [vmem:[%s752_s3 + $0x18] sm:$0xff]   ;;  %v671_v1 = vmov 0.0   ;;  %v644_v2 = vld [vmem:[%s752_s3 + $0x10] sm:$0xff]   ;;  %vm672_vm0 = vmmov 0   ;;  %s759_s15 = smov (!%p286_p4, %s661_s15), 1  ;;  %v645_v3 = vld [vmem:[%s752_s3 + $0x8] sm:$0xff]  }
   0xd   : > { %605 = vmatprep.subr.bf16.mxu0 %v671_v1  ;;  %613 = vmatprep.mubr.msk.bf16.mxu0 %vm672_vm0, %v671_v1  ;;  %s291_s27 = scalar_lea.vmem %s749_s0, %s759_s15  ;;  %s297_s30 = scalar_lea.vmem %s750_s1, %s759_s15  ;;  %v646_v8 = vld [vmem:[%s752_s3] sm:$0xff]   ;;  %vm391_vm1 = vcmask 523264  }
   0xe   : > { %606 = vmatpush3.bf16.msra.mxu0 %v643_v0  ;;  %s598_s5 = sshll.u32 %s759_s15, 4  ;;  %v589_v4 = vld [vmem:[%s291_s27] ss:$0 sm:$0xff] }
   0xf   : > { %607 = vmatprep.subr.bf16.mxu0 %v671_v1  ;;  %s309_s8 = scalar_lea.vmem %s751_s2, %s598_s5  ;;  %v590_v7 = vld [vmem:[%s297_s30] ss:$0 sm:$0xff]  ;;  %s325_s13 = scalar_lea.vmem %s753_s4, %s598_s5 }
  0x10   : > { %v334_v5 = vld [vmem:[%s309_s8] sm:$0xff]  ;;  %v335_v6 = vld [vmem:[%s309_s8 + $0x8] sm:$0xff] }
  0x11   : > { %v343_v9 = vmul.f32 %v589_v4, %v334_v5  ;;  %v344_v10 = vmul.f32 %v589_v4, %v335_v6 }
  0x12   : > { %608 = vmatpush3.bf16.msra.mxu0 %v644_v2 }
  0x13   : > { %609 = vmatprep.subr.bf16.mxu0 %v671_v1  ;;  %v352_v11 = vadd.f32 %v590_v7, %v343_v9  ;;  %v353_v12 = vadd.f32 %v590_v7, %v344_v10 }
  0x15   : > { %v354_v13 = vmax.f32 %v352_v11, 0.0  ;;  %v355_v14 = vmax.f32 %v353_v12, 0.0 }
  0x16   : > { %610 = vmatpush3.bf16.msra.mxu0 %v645_v3 }
  0x17   : > { %611 = vmatprep.subr.bf16.mxu0 %v671_v1  ;;  %v356_v15 = vpack.c.bf16 %v355_v14, %v354_v13 }
  0x1a   : > { %612 = vmatpush3.bf16.msra.mxu0 %v646_v8 }
  0x1d   : > { %614 = vmatmul.mubr.msk.bf16.vlgmr.msra.gmra.mxu0 %vm391_vm1, %v356_v15 }
  0xdd   : > { %v429_v16 = vpop.f32.mrf.mxu0 }
  0xde   : > { %445 = vst [vmem:[%s325_s13] sm:$0xff] %v429_v16 }
  0xdf   : > { %v615_v17 = vpop.f32.mrf.mxu0 }
  0xe1   : > { %v432_v18 = vpop.f32.mrf.mxu0 }
  0xe2   : > { %446 = vst [vmem:[%s325_s13 + $0x8] sm:$0xff] %v432_v18 }
  0xe3   : > { %v616_v19 = vpop.f32.mrf.mxu0 }
  0xe4 PF: > { %s14_s17 = sadd.s32 1, %s669_s17   ;;  %s754_s15 = smov %s665_s16 }
  0xe5   : > { %p11_p5 = scmp.ge.s32.totalorder %s14_s17, 4   ;;  %s755_s16 = smov %s757_s18 }
  0xe7   :  { %13 = sbr.rel (!%p11_p5) target bundleno = 2 (0x2), region = 83 }

</bundles_post_ra>
